<compile_context>
chip_gen: v5e
topology: v5e:2x2
jax: 0.10.0
libtpu: 0.0.40
codegen_flags: <defaults>
</compile_context>

<pallas_src>
import functools

import jax
import jax.numpy as jnp
from jax.experimental import pallas as pl
from jax.experimental.pallas import tpu as pltpu

# ----------------------------- tiny BERT config ------------------------------
VOCAB = 128
HIDDEN = 32
HEADS = 2
HEAD_DIM = HIDDEN // HEADS
LAYERS = 2
INTERMEDIATE = 64
MAX_POS = 16
TYPE_VOCAB = 2
LABELS = 2
LN_EPS = 1e-12

BATCH = 2
SEQ = 8


# ------------------------- in-kernel math helpers -----------------------------
def _gelu(x):
    # tanh approximation of GELU (BERT "gelu_new"-style); exact-erf differs <1e-3.
    return 0.5 * x * (1.0 + jnp.tanh(0.7978845608028654 * (x + 0.044715 * x * x * x)))


def _layernorm(x, g, b):
    mean = jnp.mean(x, axis=-1, keepdims=True)
    var = jnp.mean((x - mean) ** 2, axis=-1, keepdims=True)
    inv = jax.lax.rsqrt(var + LN_EPS)
    return (x - mean) * inv * g + b


# ----------------------------- fused forward kernel ----------------------------
def _bert_fused_kernel(
    tok_ref, word_emb_ref, pos_type_ref, emb_ln_g_ref, emb_ln_b_ref,
    wqkv_ref, bqkv_ref, wo_ref, bo_ref, ln1_g_ref, ln1_b_ref,
    w_ff1_ref, b_ff1_ref, w_ff2_ref, b_ff2_ref, ln2_g_ref, ln2_b_ref,
    pooler_w_ref, pooler_b_ref, cls_w_ref, cls_b_ref,
    logits_ref, *, batch, seq):
    bs = batch * seq
    scale = 1.0 / float(HEAD_DIM) ** 0.5

    # ---- embeddings: one-hot gather on the MXU ([BS,128] @ [128,32]) ----
    tok = tok_ref[...]                                            # [BS, 1] int32
    vocab_ids = jax.lax.broadcasted_iota(jnp.int32, (bs, VOCAB), 1)
    onehot = (vocab_ids == tok).astype(jnp.float32)               # [BS, VOCAB]
    emb = jnp.dot(onehot, word_emb_ref[...], preferred_element_type=jnp.float32)
    emb = emb + pos_type_ref[...]                                 # + position + token-type
    h = _layernorm(emb, emb_ln_g_ref[...], emb_ln_b_ref[...])     # [BS, H]

    # ---- encoder layers (unrolled; all weights already VMEM-resident) ----
    for l in range(LAYERS):
        # fused QKV projection: one [BS,32] @ [32,96] matmul, then slice in VMEM
        qkv = jnp.dot(h, wqkv_ref[l], preferred_element_type=jnp.float32) + bqkv_ref[l]
        q = qkv[:, 0 * HIDDEN:1 * HIDDEN]
        k = qkv[:, 1 * HIDDEN:2 * HIDDEN]
        v = qkv[:, 2 * HIDDEN:3 * HIDDEN]

        # per-(batch, head) attention, unrolled: B*HEADS = 4 tiny [S,S] matmuls
        batch_rows = []
        for b in range(batch):
            r0 = b * seq
            head_cols = []
            for hd in range(HEADS):
                c0 = hd * HEAD_DIM
                qh = q[r0:r0 + seq, c0:c0 + HEAD_DIM]
                kh = k[r0:r0 + seq, c0:c0 + HEAD_DIM]
                vh = v[r0:r0 + seq, c0:c0 + HEAD_DIM]
                s = jnp.dot(qh, kh.T, preferred_element_type=jnp.float32) * scale
                s = s - jnp.max(s, axis=-1, keepdims=True)
                p = jnp.exp(s)
                p = p * pl.reciprocal(jnp.sum(p, axis=-1, keepdims=True), approx=True)
                head_cols.append(jnp.dot(p, vh, preferred_element_type=jnp.float32))
            batch_rows.append(jnp.concatenate(head_cols, axis=1))   # [S, H]
        ctx = jnp.concatenate(batch_rows, axis=0)                   # [BS, H]

        attn_out = jnp.dot(ctx, wo_ref[l], preferred_element_type=jnp.float32) + bo_ref[l]
        h = _layernorm(attn_out + h, ln1_g_ref[l], ln1_b_ref[l])

        ff = _gelu(jnp.dot(h, w_ff1_ref[l], preferred_element_type=jnp.float32) + b_ff1_ref[l])
        ff = jnp.dot(ff, w_ff2_ref[l], preferred_element_type=jnp.float32) + b_ff2_ref[l]
        h = _layernorm(ff + h, ln2_g_ref[l], ln2_b_ref[l])

    # ---- pooler (CLS token) + classifier head, still inside the kernel ----
    # TODO(synk): no attention mask / token_type_ids handling (synthetic
    # single-segment, unpadded input), matching the prior version.
    cls = jnp.concatenate([h[b * seq:b * seq + 1, :] for b in range(batch)], axis=0)  # [B, H]
    pooled = jnp.tanh(
        jnp.dot(cls, pooler_w_ref[...], preferred_element_type=jnp.float32) + pooler_b_ref[...])
    logits = jnp.dot(pooled, cls_w_ref[...], preferred_element_type=jnp.float32) + cls_b_ref[...]
    logits_ref[...] = logits.astype(logits_ref.dtype)


def _zero_index(nd, i):
    return (0,) * nd


# ------------------------------ model forward ----------------------------------
def hf_language_forward(params, tokens):
    """Equivalent of HuggingFaceLanguage.forward(tokens) -> logits [batch, 2]."""
    B, S = tokens.shape
    BS = B * S

    # Tiny parameter-side glue (computed once under jit): positional + token-type
    # embedding slab, broadcast over the batch, and flat int32 token ids.
    pos_type = jnp.tile(params["pos_emb"][:S], (B, 1)) + params["type_emb"][0][None, :]
    tok = tokens.reshape(BS, 1).astype(jnp.int32)

    args = [
        tok,                                    # [BS, 1] int32
        params["word_emb"],                     # [VOCAB, H]
        pos_type,                               # [BS, H]
        params["emb_ln_g"].reshape(1, HIDDEN),
        params["emb_ln_b"].reshape(1, HIDDEN),
        params["wqkv"], params["bqkv"],         # [L, H, 3H], [L, 1, 3H]
        params["wo"], params["bo"],             # [L, H, H],  [L, 1, H]
        params["ln1_g"], params["ln1_b"],       # [L, 1, H]
        params["w_ff1"], params["b_ff1"],       # [L, H, I],  [L, 1, I]
        params["w_ff2"], params["b_ff2"],       # [L, I, H],  [L, 1, H]
        params["ln2_g"], params["ln2_b"],       # [L, 1, H]
        params["pooler_w"],                     # [H, H]
        params["pooler_b"].reshape(1, HIDDEN),
        params["cls_w"],                        # [H, LABELS]
        params["cls_b"].reshape(1, LABELS),
    ]
    in_specs = [pl.BlockSpec(a.shape, functools.partial(_zero_index, a.ndim)) for a in args]

    return pl.pallas_call(
        functools.partial(_bert_fused_kernel, batch=B, seq=S),
        out_shape=jax.ShapeDtypeStruct((B, LABELS), jnp.float32),
        grid=(1,),
        in_specs=in_specs,
        out_specs=pl.BlockSpec((B, LABELS), lambda i: (0, 0)),
        compiler_params=pltpu.CompilerParams(dimension_semantics=("arbitrary",)),
    )(*args)


# ------------------------------ parameter setup --------------------------------
def init_params(key):
    def nrm(k, shape, scale=0.02):
        return (scale * jax.random.normal(k, shape)).astype(jnp.float32)

    keys = jax.random.split(key, 8 + LAYERS)
    p = {
        "word_emb": nrm(keys[0], (VOCAB, HIDDEN)),
        "pos_emb": nrm(keys[1], (MAX_POS, HIDDEN)),
        "type_emb": nrm(keys[2], (TYPE_VOCAB, HIDDEN)),
        "emb_ln_g": jnp.ones((HIDDEN,), jnp.float32),
        "emb_ln_b": jnp.zeros((HIDDEN,), jnp.float32),
        "pooler_w": nrm(keys[3], (HIDDEN, HIDDEN)),
        "pooler_b": jnp.zeros((HIDDEN,), jnp.float32),
        "cls_w": nrm(keys[4], (HIDDEN, LABELS)),
        "cls_b": jnp.zeros((LABELS,), jnp.float32),
    }
    wqkv, bqkv, wo, bo, ln1g, ln1b = [], [], [], [], [], []
    wf1, bf1, wf2, bf2, ln2g, ln2b = [], [], [], [], [], []
    for l in range(LAYERS):
        lk = jax.random.split(keys[8 + l], 6)
        # fused QKV weight: [H, 3H] = concat(wq, wk, wv) along the output dim
        wqkv.append(jnp.concatenate([nrm(lk[0], (HIDDEN, HIDDEN)),
                                     nrm(lk[1], (HIDDEN, HIDDEN)),
                                     nrm(lk[2], (HIDDEN, HIDDEN))], axis=1))
        bqkv.append(jnp.zeros((1, 3 * HIDDEN), jnp.float32))
        wo.append(nrm(lk[3], (HIDDEN, HIDDEN)))
        bo.append(jnp.zeros((1, HIDDEN), jnp.float32))
        ln1g.append(jnp.ones((1, HIDDEN), jnp.float32))
        ln1b.append(jnp.zeros((1, HIDDEN), jnp.float32))
        wf1.append(nrm(lk[4], (HIDDEN, INTERMEDIATE)))
        bf1.append(jnp.zeros((1, INTERMEDIATE), jnp.float32))
        wf2.append(nrm(lk[5], (INTERMEDIATE, HIDDEN)))
        bf2.append(jnp.zeros((1, HIDDEN), jnp.float32))
        ln2g.append(jnp.ones((1, HIDDEN), jnp.float32))
        ln2b.append(jnp.zeros((1, HIDDEN), jnp.float32))
    p.update({
        "wqkv": jnp.stack(wqkv), "bqkv": jnp.stack(bqkv),
        "wo": jnp.stack(wo), "bo": jnp.stack(bo),
        "ln1_g": jnp.stack(ln1g), "ln1_b": jnp.stack(ln1b),
        "w_ff1": jnp.stack(wf1), "b_ff1": jnp.stack(bf1),
        "w_ff2": jnp.stack(wf2), "b_ff2": jnp.stack(bf2),
        "ln2_g": jnp.stack(ln2g), "ln2_b": jnp.stack(ln2b),
    })
    return p


# ----------------------------------- main ---------------------------------------
if __name__ == "__main__":
    key = jax.random.PRNGKey(0)
    pkey, tkey = jax.random.split(key)
    params = init_params(pkey)
    tokens = jax.random.randint(tkey, (BATCH, SEQ), 0, VOCAB, dtype=jnp.int32)

    logits = jax.jit(hf_language_forward)(params, tokens)
    logits = jax.block_until_ready(logits)
    assert logits.shape == (BATCH, LABELS), logits.shape
    assert logits.dtype == jnp.float32
    assert bool(jnp.all(jnp.isfinite(logits)))
    print("KERNEL_OK")
</pallas_src>

<mosaic_0001>
module attributes {stable_mosaic.version = 11 : i64} {
  func.func @_bert_fused_kernel(%arg0: i32, %arg1: memref<16x1xi32, #tpu.memory_space<vmem>>, %arg2: memref<128x32xf32, #tpu.memory_space<vmem>>, %arg3: memref<16x32xf32, #tpu.memory_space<vmem>>, %arg4: memref<1x32xf32, #tpu.memory_space<vmem>>, %arg5: memref<1x32xf32, #tpu.memory_space<vmem>>, %arg6: memref<2x32x96xf32, #tpu.memory_space<vmem>>, %arg7: memref<2x1x96xf32, #tpu.memory_space<vmem>>, %arg8: memref<2x32x32xf32, #tpu.memory_space<vmem>>, %arg9: memref<2x1x32xf32, #tpu.memory_space<vmem>>, %arg10: memref<2x1x32xf32, #tpu.memory_space<vmem>>, %arg11: memref<2x1x32xf32, #tpu.memory_space<vmem>>, %arg12: memref<2x32x64xf32, #tpu.memory_space<vmem>>, %arg13: memref<2x1x64xf32, #tpu.memory_space<vmem>>, %arg14: memref<2x64x32xf32, #tpu.memory_space<vmem>>, %arg15: memref<2x1x32xf32, #tpu.memory_space<vmem>>, %arg16: memref<2x1x32xf32, #tpu.memory_space<vmem>>, %arg17: memref<2x1x32xf32, #tpu.memory_space<vmem>>, %arg18: memref<32x32xf32, #tpu.memory_space<vmem>>, %arg19: memref<1x32xf32, #tpu.memory_space<vmem>>, %arg20: memref<32x2xf32, #tpu.memory_space<vmem>>, %arg21: memref<1x2xf32, #tpu.memory_space<vmem>>, %arg22: memref<2x2xf32, #tpu.memory_space<vmem>>) attributes {dimension_semantics = [#tpu.dimension_semantics<arbitrary>], iteration_bounds = array<i64: 1>, scalar_prefetch = 0 : i64, scratch_operands = 0 : i64, tpu.core_type = #tpu.core_type<tc>, window_params = [{pipeline_mode = #tpu.pipeline_mode<synchronous>, transform_indices = @transform_0, window_bounds = array<i64: 16, 1>}, {pipeline_mode = #tpu.pipeline_mode<synchronous>, transform_indices = @transform_1, window_bounds = array<i64: 128, 32>}, {pipeline_mode = #tpu.pipeline_mode<synchronous>, transform_indices = @transform_2, window_bounds = array<i64: 16, 32>}, {pipeline_mode = #tpu.pipeline_mode<synchronous>, transform_indices = @transform_3, window_bounds = array<i64: 1, 32>}, {pipeline_mode = #tpu.pipeline_mode<synchronous>, transform_indices = @transform_4, window_bounds = array<i64: 1, 32>}, {pipeline_mode = #tpu.pipeline_mode<synchronous>, transform_indices = @transform_5, window_bounds = array<i64: 2, 32, 96>}, {pipeline_mode = #tpu.pipeline_mode<synchronous>, transform_indices = @transform_6, window_bounds = array<i64: 2, 1, 96>}, {pipeline_mode = #tpu.pipeline_mode<synchronous>, transform_indices = @transform_7, window_bounds = array<i64: 2, 32, 32>}, {pipeline_mode = #tpu.pipeline_mode<synchronous>, transform_indices = @transform_8, window_bounds = array<i64: 2, 1, 32>}, {pipeline_mode = #tpu.pipeline_mode<synchronous>, transform_indices = @transform_9, window_bounds = array<i64: 2, 1, 32>}, {pipeline_mode = #tpu.pipeline_mode<synchronous>, transform_indices = @transform_10, window_bounds = array<i64: 2, 1, 32>}, {pipeline_mode = #tpu.pipeline_mode<synchronous>, transform_indices = @transform_11, window_bounds = array<i64: 2, 32, 64>}, {pipeline_mode = #tpu.pipeline_mode<synchronous>, transform_indices = @transform_12, window_bounds = array<i64: 2, 1, 64>}, {pipeline_mode = #tpu.pipeline_mode<synchronous>, transform_indices = @transform_13, window_bounds = array<i64: 2, 64, 32>}, {pipeline_mode = #tpu.pipeline_mode<synchronous>, transform_indices = @transform_14, window_bounds = array<i64: 2, 1, 32>}, {pipeline_mode = #tpu.pipeline_mode<synchronous>, transform_indices = @transform_15, window_bounds = array<i64: 2, 1, 32>}, {pipeline_mode = #tpu.pipeline_mode<synchronous>, transform_indices = @transform_16, window_bounds = array<i64: 2, 1, 32>}, {pipeline_mode = #tpu.pipeline_mode<synchronous>, transform_indices = @transform_17, window_bounds = array<i64: 32, 32>}, {pipeline_mode = #tpu.pipeline_mode<synchronous>, transform_indices = @transform_18, window_bounds = array<i64: 1, 32>}, {pipeline_mode = #tpu.pipeline_mode<synchronous>, transform_indices = @transform_19, window_bounds = array<i64: 32, 2>}, {pipeline_mode = #tpu.pipeline_mode<synchronous>, transform_indices = @transform_20, window_bounds = array<i64: 1, 2>}, {pipeline_mode = #tpu.pipeline_mode<synchronous>, transform_indices = @transform_21, window_bounds = array<i64: 2, 2>}]} {
    %c0 = arith.constant 0 : index
    %c0_0 = arith.constant 0 : index
    %0 = vector.load %arg1[%c0, %c0_0] : memref<16x1xi32, #tpu.memory_space<vmem>>, vector<16x1xi32>
    %1 = tpu.iota {dimensions = array<i32: 1>} : vector<16x128xi32>
    %2 = vector.broadcast %0 : vector<16x1xi32> to vector<16x128xi32>
    %3 = arith.cmpi eq, %1, %2 : vector<16x128xi32>
    %4 = arith.extui %3 : vector<16x128xi1> to vector<16x128xi32>
    %5 = arith.sitofp %4 : vector<16x128xi32> to vector<16x128xf32>
    %c0_1 = arith.constant 0 : index
    %c0_2 = arith.constant 0 : index
    %6 = vector.load %arg2[%c0_1, %c0_2] : memref<128x32xf32, #tpu.memory_space<vmem>>, vector<128x32xf32>
    %cst = arith.constant dense<0.000000e+00> : vector<16x32xf32>
    %7 = tpu.matmul %5, %6, %cst {dimension_numbers = #tpu.dot_dimension_numbers<[1], [0], [0], [1], [0, 0, 1, 1], [], []>} : vector<16x128xf32>, vector<128x32xf32>, vector<16x32xf32> -> vector<16x32xf32>
    %c0_3 = arith.constant 0 : index
    %c0_4 = arith.constant 0 : index
    %8 = vector.load %arg3[%c0_3, %c0_4] : memref<16x32xf32, #tpu.memory_space<vmem>>, vector<16x32xf32>
    %9 = arith.addf %7, %8 : vector<16x32xf32>
    %c0_5 = arith.constant 0 : index
    %c0_6 = arith.constant 0 : index
    %10 = vector.load %arg4[%c0_5, %c0_6] : memref<1x32xf32, #tpu.memory_space<vmem>>, vector<1x32xf32>
    %c0_7 = arith.constant 0 : index
    %c0_8 = arith.constant 0 : index
    %11 = vector.load %arg5[%c0_7, %c0_8] : memref<1x32xf32, #tpu.memory_space<vmem>>, vector<1x32xf32>
    %cst_9 = arith.constant dense<0.000000e+00> : vector<16xf32>
    %12 = vector.multi_reduction <add>, %9, %cst_9 [1] : vector<16x32xf32> to vector<16xf32>
    %13 = vector.shape_cast %12 : vector<16xf32> to vector<16x1xf32>
    %cst_10 = arith.constant 3.200000e+01 : f32
    %14 = vector.broadcast %cst_10 : f32 to vector<16x1xf32>
    %15 = arith.divf %13, %14 : vector<16x1xf32>
    %16 = vector.broadcast %15 : vector<16x1xf32> to vector<16x32xf32>
    %17 = arith.subf %9, %16 : vector<16x32xf32>
    %18 = arith.mulf %17, %17 : vector<16x32xf32>
    %cst_11 = arith.constant dense<0.000000e+00> : vector<16xf32>
    %19 = vector.multi_reduction <add>, %18, %cst_11 [1] : vector<16x32xf32> to vector<16xf32>
    %20 = vector.shape_cast %19 : vector<16xf32> to vector<16x1xf32>
    %cst_12 = arith.constant 3.200000e+01 : f32
    %21 = vector.broadcast %cst_12 : f32 to vector<16x1xf32>
    %22 = arith.divf %20, %21 : vector<16x1xf32>
    %cst_13 = arith.constant 9.99999996E-13 : f32
    %23 = vector.broadcast %cst_13 : f32 to vector<16x1xf32>
    %24 = arith.addf %22, %23 : vector<16x1xf32>
    %25 = math.rsqrt %24 : vector<16x1xf32>
    %26 = vector.broadcast %15 : vector<16x1xf32> to vector<16x32xf32>
    %27 = arith.subf %9, %26 : vector<16x32xf32>
    %28 = vector.broadcast %25 : vector<16x1xf32> to vector<16x32xf32>
    %29 = arith.mulf %27, %28 : vector<16x32xf32>
    %30 = vector.broadcast %10 : vector<1x32xf32> to vector<16x32xf32>
    %31 = arith.mulf %29, %30 : vector<16x32xf32>
    %32 = vector.broadcast %11 : vector<1x32xf32> to vector<16x32xf32>
    %33 = arith.addf %31, %32 : vector<16x32xf32>
    %c0_14 = arith.constant 0 : index
    %c0_15 = arith.constant 0 : index
    %c0_16 = arith.constant 0 : index
    %34 = vector.load %arg6[%c0_14, %c0_15, %c0_16] : memref<2x32x96xf32, #tpu.memory_space<vmem>>, vector<1x32x96xf32>
    %35 = vector.shape_cast %34 : vector<1x32x96xf32> to vector<32x96xf32>
    %cst_17 = arith.constant dense<0.000000e+00> : vector<16x96xf32>
    %36 = tpu.matmul %33, %35, %cst_17 {dimension_numbers = #tpu.dot_dimension_numbers<[1], [0], [0], [1], [0, 0, 1, 1], [], []>} : vector<16x32xf32>, vector<32x96xf32>, vector<16x96xf32> -> vector<16x96xf32>
    %c0_18 = arith.constant 0 : index
    %c0_19 = arith.constant 0 : index
    %c0_20 = arith.constant 0 : index
    %37 = vector.load %arg7[%c0_18, %c0_19, %c0_20] : memref<2x1x96xf32, #tpu.memory_space<vmem>>, vector<1x1x96xf32>
    %38 = vector.shape_cast %37 : vector<1x1x96xf32> to vector<1x96xf32>
    %39 = vector.broadcast %38 : vector<1x96xf32> to vector<16x96xf32>
    %40 = arith.addf %36, %39 : vector<16x96xf32>
    %41 = vector.extract_strided_slice %40 {offsets = [0, 0], sizes = [16, 32], strides = [1, 1]} : vector<16x96xf32> to vector<16x32xf32>
    %42 = vector.extract_strided_slice %40 {offsets = [0, 32], sizes = [16, 32], strides = [1, 1]} : vector<16x96xf32> to vector<16x32xf32>
    %43 = vector.extract_strided_slice %40 {offsets = [0, 64], sizes = [16, 32], strides = [1, 1]} : vector<16x96xf32> to vector<16x32xf32>
    %44 = vector.extract_strided_slice %41 {offsets = [0, 0], sizes = [8, 16], strides = [1, 1]} : vector<16x32xf32> to vector<8x16xf32>
    %45 = vector.extract_strided_slice %42 {offsets = [0, 0], sizes = [8, 16], strides = [1, 1]} : vector<16x32xf32> to vector<8x16xf32>
    %46 = vector.extract_strided_slice %43 {offsets = [0, 0], sizes = [8, 16], strides = [1, 1]} : vector<16x32xf32> to vector<8x16xf32>
    %47 = tpu.transpose %45, [1, 0] : vector<8x16xf32> -> vector<16x8xf32>
    %cst_21 = arith.constant dense<0.000000e+00> : vector<8x8xf32>
    %48 = tpu.matmul %44, %47, %cst_21 {dimension_numbers = #tpu.dot_dimension_numbers<[1], [0], [0], [1], [0, 0, 1, 1], [], []>} : vector<8x16xf32>, vector<16x8xf32>, vector<8x8xf32> -> vector<8x8xf32>
    %cst_22 = arith.constant 2.500000e-01 : f32
    %49 = vector.broadcast %cst_22 : f32 to vector<8x8xf32>
    %50 = arith.mulf %48, %49 : vector<8x8xf32>
    %cst_23 = arith.constant dense<0xFF800000> : vector<8xf32>
    %51 = vector.multi_reduction <maximumf>, %50, %cst_23 [1] : vector<8x8xf32> to vector<8xf32>
    %52 = vector.shape_cast %51 : vector<8xf32> to vector<8x1xf32>
    %53 = vector.broadcast %52 : vector<8x1xf32> to vector<8x8xf32>
    %54 = arith.subf %50, %53 : vector<8x8xf32>
    %55 = math.exp %54 : vector<8x8xf32>
    %cst_24 = arith.constant dense<0.000000e+00> : vector<8xf32>
    %56 = vector.multi_reduction <add>, %55, %cst_24 [1] : vector<8x8xf32> to vector<8xf32>
    %57 = vector.shape_cast %56 : vector<8xf32> to vector<8x1xf32>
    %58 = tpu.reciprocal %57 {approx = true} : vector<8x1xf32> -> vector<8x1xf32>
    %59 = vector.broadcast %58 : vector<8x1xf32> to vector<8x8xf32>
    %60 = arith.mulf %55, %59 : vector<8x8xf32>
    %cst_25 = arith.constant dense<0.000000e+00> : vector<8x16xf32>
    %61 = tpu.matmul %60, %46, %cst_25 {dimension_numbers = #tpu.dot_dimension_numbers<[1], [0], [0], [1], [0, 0, 1, 1], [], []>} : vector<8x8xf32>, vector<8x16xf32>, vector<8x16xf32> -> vector<8x16xf32>
    %62 = vector.extract_strided_slice %41 {offsets = [0, 16], sizes = [8, 16], strides = [1, 1]} : vector<16x32xf32> to vector<8x16xf32>
    %63 = vector.extract_strided_slice %42 {offsets = [0, 16], sizes = [8, 16], strides = [1, 1]} : vector<16x32xf32> to vector<8x16xf32>
    %64 = vector.extract_strided_slice %43 {offsets = [0, 16], sizes = [8, 16], strides = [1, 1]} : vector<16x32xf32> to vector<8x16xf32>
    %65 = tpu.transpose %63, [1, 0] : vector<8x16xf32> -> vector<16x8xf32>
    %cst_26 = arith.constant dense<0.000000e+00> : vector<8x8xf32>
    %66 = tpu.matmul %62, %65, %cst_26 {dimension_numbers = #tpu.dot_dimension_numbers<[1], [0], [0], [1], [0, 0, 1, 1], [], []>} : vector<8x16xf32>, vector<16x8xf32>, vector<8x8xf32> -> vector<8x8xf32>
    %cst_27 = arith.constant 2.500000e-01 : f32
    %67 = vector.broadcast %cst_27 : f32 to vector<8x8xf32>
    %68 = arith.mulf %66, %67 : vector<8x8xf32>
    %cst_28 = arith.constant dense<0xFF800000> : vector<8xf32>
    %69 = vector.multi_reduction <maximumf>, %68, %cst_28 [1] : vector<8x8xf32> to vector<8xf32>
    %70 = vector.shape_cast %69 : vector<8xf32> to vector<8x1xf32>
    %71 = vector.broadcast %70 : vector<8x1xf32> to vector<8x8xf32>
    %72 = arith.subf %68, %71 : vector<8x8xf32>
    %73 = math.exp %72 : vector<8x8xf32>
    %cst_29 = arith.constant dense<0.000000e+00> : vector<8xf32>
    %74 = vector.multi_reduction <add>, %73, %cst_29 [1] : vector<8x8xf32> to vector<8xf32>
    %75 = vector.shape_cast %74 : vector<8xf32> to vector<8x1xf32>
    %76 = tpu.reciprocal %75 {approx = true} : vector<8x1xf32> -> vector<8x1xf32>
    %77 = vector.broadcast %76 : vector<8x1xf32> to vector<8x8xf32>
    %78 = arith.mulf %73, %77 : vector<8x8xf32>
    %cst_30 = arith.constant dense<0.000000e+00> : vector<8x16xf32>
    %79 = tpu.matmul %78, %64, %cst_30 {dimension_numbers = #tpu.dot_dimension_numbers<[1], [0], [0], [1], [0, 0, 1, 1], [], []>} : vector<8x8xf32>, vector<8x16xf32>, vector<8x16xf32> -> vector<8x16xf32>
    %80 = tpu.concatenate %61, %79 in 1 : vector<8x16xf32>, vector<8x16xf32> -> vector<8x32xf32>
    %81 = vector.extract_strided_slice %41 {offsets = [8, 0], sizes = [8, 16], strides = [1, 1]} : vector<16x32xf32> to vector<8x16xf32>
    %82 = vector.extract_strided_slice %42 {offsets = [8, 0], sizes = [8, 16], strides = [1, 1]} : vector<16x32xf32> to vector<8x16xf32>
    %83 = vector.extract_strided_slice %43 {offsets = [8, 0], sizes = [8, 16], strides = [1, 1]} : vector<16x32xf32> to vector<8x16xf32>
    %84 = tpu.transpose %82, [1, 0] : vector<8x16xf32> -> vector<16x8xf32>
    %cst_31 = arith.constant dense<0.000000e+00> : vector<8x8xf32>
    %85 = tpu.matmul %81, %84, %cst_31 {dimension_numbers = #tpu.dot_dimension_numbers<[1], [0], [0], [1], [0, 0, 1, 1], [], []>} : vector<8x16xf32>, vector<16x8xf32>, vector<8x8xf32> -> vector<8x8xf32>
    %cst_32 = arith.constant 2.500000e-01 : f32
    %86 = vector.broadcast %cst_32 : f32 to vector<8x8xf32>
    %87 = arith.mulf %85, %86 : vector<8x8xf32>
    %cst_33 = arith.constant dense<0xFF800000> : vector<8xf32>
    %88 = vector.multi_reduction <maximumf>, %87, %cst_33 [1] : vector<8x8xf32> to vector<8xf32>
    %89 = vector.shape_cast %88 : vector<8xf32> to vector<8x1xf32>
    %90 = vector.broadcast %89 : vector<8x1xf32> to vector<8x8xf32>
    %91 = arith.subf %87, %90 : vector<8x8xf32>
    %92 = math.exp %91 : vector<8x8xf32>
    %cst_34 = arith.constant dense<0.000000e+00> : vector<8xf32>
    %93 = vector.multi_reduction <add>, %92, %cst_34 [1] : vector<8x8xf32> to vector<8xf32>
    %94 = vector.shape_cast %93 : vector<8xf32> to vector<8x1xf32>
    %95 = tpu.reciprocal %94 {approx = true} : vector<8x1xf32> -> vector<8x1xf32>
    %96 = vector.broadcast %95 : vector<8x1xf32> to vector<8x8xf32>
    %97 = arith.mulf %92, %96 : vector<8x8xf32>
    %cst_35 = arith.constant dense<0.000000e+00> : vector<8x16xf32>
    %98 = tpu.matmul %97, %83, %cst_35 {dimension_numbers = #tpu.dot_dimension_numbers<[1], [0], [0], [1], [0, 0, 1, 1], [], []>} : vector<8x8xf32>, vector<8x16xf32>, vector<8x16xf32> -> vector<8x16xf32>
    %99 = vector.extract_strided_slice %41 {offsets = [8, 16], sizes = [8, 16], strides = [1, 1]} : vector<16x32xf32> to vector<8x16xf32>
    %100 = vector.extract_strided_slice %42 {offsets = [8, 16], sizes = [8, 16], strides = [1, 1]} : vector<16x32xf32> to vector<8x16xf32>
    %101 = vector.extract_strided_slice %43 {offsets = [8, 16], sizes = [8, 16], strides = [1, 1]} : vector<16x32xf32> to vector<8x16xf32>
    %102 = tpu.transpose %100, [1, 0] : vector<8x16xf32> -> vector<16x8xf32>
    %cst_36 = arith.constant dense<0.000000e+00> : vector<8x8xf32>
    %103 = tpu.matmul %99, %102, %cst_36 {dimension_numbers = #tpu.dot_dimension_numbers<[1], [0], [0], [1], [0, 0, 1, 1], [], []>} : vector<8x16xf32>, vector<16x8xf32>, vector<8x8xf32> -> vector<8x8xf32>
    %cst_37 = arith.constant 2.500000e-01 : f32
    %104 = vector.broadcast %cst_37 : f32 to vector<8x8xf32>
    %105 = arith.mulf %103, %104 : vector<8x8xf32>
    %cst_38 = arith.constant dense<0xFF800000> : vector<8xf32>
    %106 = vector.multi_reduction <maximumf>, %105, %cst_38 [1] : vector<8x8xf32> to vector<8xf32>
    %107 = vector.shape_cast %106 : vector<8xf32> to vector<8x1xf32>
    %108 = vector.broadcast %107 : vector<8x1xf32> to vector<8x8xf32>
    %109 = arith.subf %105, %108 : vector<8x8xf32>
    %110 = math.exp %109 : vector<8x8xf32>
    %cst_39 = arith.constant dense<0.000000e+00> : vector<8xf32>
    %111 = vector.multi_reduction <add>, %110, %cst_39 [1] : vector<8x8xf32> to vector<8xf32>
    %112 = vector.shape_cast %111 : vector<8xf32> to vector<8x1xf32>
    %113 = tpu.reciprocal %112 {approx = true} : vector<8x1xf32> -> vector<8x1xf32>
    %114 = vector.broadcast %113 : vector<8x1xf32> to vector<8x8xf32>
    %115 = arith.mulf %110, %114 : vector<8x8xf32>
    %cst_40 = arith.constant dense<0.000000e+00> : vector<8x16xf32>
    %116 = tpu.matmul %115, %101, %cst_40 {dimension_numbers = #tpu.dot_dimension_numbers<[1], [0], [0], [1], [0, 0, 1, 1], [], []>} : vector<8x8xf32>, vector<8x16xf32>, vector<8x16xf32> -> vector<8x16xf32>
    %117 = tpu.concatenate %98, %116 in 1 : vector<8x16xf32>, vector<8x16xf32> -> vector<8x32xf32>
    %118 = tpu.concatenate %80, %117 in 0 : vector<8x32xf32>, vector<8x32xf32> -> vector<16x32xf32>
    %c0_41 = arith.constant 0 : index
    %c0_42 = arith.constant 0 : index
    %c0_43 = arith.constant 0 : index
    %119 = vector.load %arg8[%c0_41, %c0_42, %c0_43] : memref<2x32x32xf32, #tpu.memory_space<vmem>>, vector<1x32x32xf32>
    %120 = vector.shape_cast %119 : vector<1x32x32xf32> to vector<32x32xf32>
    %cst_44 = arith.constant dense<0.000000e+00> : vector<16x32xf32>
    %121 = tpu.matmul %118, %120, %cst_44 {dimension_numbers = #tpu.dot_dimension_numbers<[1], [0], [0], [1], [0, 0, 1, 1], [], []>} : vector<16x32xf32>, vector<32x32xf32>, vector<16x32xf32> -> vector<16x32xf32>
    %c0_45 = arith.constant 0 : index
    %c0_46 = arith.constant 0 : index
    %c0_47 = arith.constant 0 : index
    %122 = vector.load %arg9[%c0_45, %c0_46, %c0_47] : memref<2x1x32xf32, #tpu.memory_space<vmem>>, vector<1x1x32xf32>
    %123 = vector.shape_cast %122 : vector<1x1x32xf32> to vector<1x32xf32>
    %124 = vector.broadcast %123 : vector<1x32xf32> to vector<16x32xf32>
    %125 = arith.addf %121, %124 : vector<16x32xf32>
    %126 = arith.addf %125, %33 : vector<16x32xf32>
    %c0_48 = arith.constant 0 : index
    %c0_49 = arith.constant 0 : index
    %c0_50 = arith.constant 0 : index
    %127 = vector.load %arg10[%c0_48, %c0_49, %c0_50] : memref<2x1x32xf32, #tpu.memory_space<vmem>>, vector<1x1x32xf32>
    %128 = vector.shape_cast %127 : vector<1x1x32xf32> to vector<1x32xf32>
    %c0_51 = arith.constant 0 : index
    %c0_52 = arith.constant 0 : index
    %c0_53 = arith.constant 0 : index
    %129 = vector.load %arg11[%c0_51, %c0_52, %c0_53] : memref<2x1x32xf32, #tpu.memory_space<vmem>>, vector<1x1x32xf32>
    %130 = vector.shape_cast %129 : vector<1x1x32xf32> to vector<1x32xf32>
    %cst_54 = arith.constant dense<0.000000e+00> : vector<16xf32>
    %131 = vector.multi_reduction <add>, %126, %cst_54 [1] : vector<16x32xf32> to vector<16xf32>
    %132 = vector.shape_cast %131 : vector<16xf32> to vector<16x1xf32>
    %cst_55 = arith.constant 3.200000e+01 : f32
    %133 = vector.broadcast %cst_55 : f32 to vector<16x1xf32>
    %134 = arith.divf %132, %133 : vector<16x1xf32>
    %135 = vector.broadcast %134 : vector<16x1xf32> to vector<16x32xf32>
    %136 = arith.subf %126, %135 : vector<16x32xf32>
    %137 = arith.mulf %136, %136 : vector<16x32xf32>
    %cst_56 = arith.constant dense<0.000000e+00> : vector<16xf32>
    %138 = vector.multi_reduction <add>, %137, %cst_56 [1] : vector<16x32xf32> to vector<16xf32>
    %139 = vector.shape_cast %138 : vector<16xf32> to vector<16x1xf32>
    %cst_57 = arith.constant 3.200000e+01 : f32
    %140 = vector.broadcast %cst_57 : f32 to vector<16x1xf32>
    %141 = arith.divf %139, %140 : vector<16x1xf32>
    %cst_58 = arith.constant 9.99999996E-13 : f32
    %142 = vector.broadcast %cst_58 : f32 to vector<16x1xf32>
    %143 = arith.addf %141, %142 : vector<16x1xf32>
    %144 = math.rsqrt %143 : vector<16x1xf32>
    %145 = vector.broadcast %134 : vector<16x1xf32> to vector<16x32xf32>
    %146 = arith.subf %126, %145 : vector<16x32xf32>
    %147 = vector.broadcast %144 : vector<16x1xf32> to vector<16x32xf32>
    %148 = arith.mulf %146, %147 : vector<16x32xf32>
    %149 = vector.broadcast %128 : vector<1x32xf32> to vector<16x32xf32>
    %150 = arith.mulf %148, %149 : vector<16x32xf32>
    %151 = vector.broadcast %130 : vector<1x32xf32> to vector<16x32xf32>
    %152 = arith.addf %150, %151 : vector<16x32xf32>
    %c0_59 = arith.constant 0 : index
    %c0_60 = arith.constant 0 : index
    %c0_61 = arith.constant 0 : index
    %153 = vector.load %arg12[%c0_59, %c0_60, %c0_61] : memref<2x32x64xf32, #tpu.memory_space<vmem>>, vector<1x32x64xf32>
    %154 = vector.shape_cast %153 : vector<1x32x64xf32> to vector<32x64xf32>
    %cst_62 = arith.constant dense<0.000000e+00> : vector<16x64xf32>
    %155 = tpu.matmul %152, %154, %cst_62 {dimension_numbers = #tpu.dot_dimension_numbers<[1], [0], [0], [1], [0, 0, 1, 1], [], []>} : vector<16x32xf32>, vector<32x64xf32>, vector<16x64xf32> -> vector<16x64xf32>
    %c0_63 = arith.constant 0 : index
    %c0_64 = arith.constant 0 : index
    %c0_65 = arith.constant 0 : index
    %156 = vector.load %arg13[%c0_63, %c0_64, %c0_65] : memref<2x1x64xf32, #tpu.memory_space<vmem>>, vector<1x1x64xf32>
    %157 = vector.shape_cast %156 : vector<1x1x64xf32> to vector<1x64xf32>
    %158 = vector.broadcast %157 : vector<1x64xf32> to vector<16x64xf32>
    %159 = arith.addf %155, %158 : vector<16x64xf32>
    %cst_66 = arith.constant 5.000000e-01 : f32
    %160 = vector.broadcast %cst_66 : f32 to vector<16x64xf32>
    %161 = arith.mulf %160, %159 : vector<16x64xf32>
    %cst_67 = arith.constant 4.471500e-02 : f32
    %162 = vector.broadcast %cst_67 : f32 to vector<16x64xf32>
    %163 = arith.mulf %162, %159 : vector<16x64xf32>
    %164 = arith.mulf %163, %159 : vector<16x64xf32>
    %165 = arith.mulf %164, %159 : vector<16x64xf32>
    %166 = arith.addf %159, %165 : vector<16x64xf32>
    %cst_68 = arith.constant 0.797884583 : f32
    %167 = vector.broadcast %cst_68 : f32 to vector<16x64xf32>
    %168 = arith.mulf %167, %166 : vector<16x64xf32>
    %169 = math.tanh %168 : vector<16x64xf32>
    %cst_69 = arith.constant 1.000000e+00 : f32
    %170 = vector.broadcast %cst_69 : f32 to vector<16x64xf32>
    %171 = arith.addf %170, %169 : vector<16x64xf32>
    %172 = arith.mulf %161, %171 : vector<16x64xf32>
    %c0_70 = arith.constant 0 : index
    %c0_71 = arith.constant 0 : index
    %c0_72 = arith.constant 0 : index
    %173 = vector.load %arg14[%c0_70, %c0_71, %c0_72] : memref<2x64x32xf32, #tpu.memory_space<vmem>>, vector<1x64x32xf32>
    %174 = vector.shape_cast %173 : vector<1x64x32xf32> to vector<64x32xf32>
    %cst_73 = arith.constant dense<0.000000e+00> : vector<16x32xf32>
    %175 = tpu.matmul %172, %174, %cst_73 {dimension_numbers = #tpu.dot_dimension_numbers<[1], [0], [0], [1], [0, 0, 1, 1], [], []>} : vector<16x64xf32>, vector<64x32xf32>, vector<16x32xf32> -> vector<16x32xf32>
    %c0_74 = arith.constant 0 : index
    %c0_75 = arith.constant 0 : index
    %c0_76 = arith.constant 0 : index
    %176 = vector.load %arg15[%c0_74, %c0_75, %c0_76] : memref<2x1x32xf32, #tpu.memory_space<vmem>>, vector<1x1x32xf32>
    %177 = vector.shape_cast %176 : vector<1x1x32xf32> to vector<1x32xf32>
    %178 = vector.broadcast %177 : vector<1x32xf32> to vector<16x32xf32>
    %179 = arith.addf %175, %178 : vector<16x32xf32>
    %180 = arith.addf %179, %152 : vector<16x32xf32>
    %c0_77 = arith.constant 0 : index
    %c0_78 = arith.constant 0 : index
    %c0_79 = arith.constant 0 : index
    %181 = vector.load %arg16[%c0_77, %c0_78, %c0_79] : memref<2x1x32xf32, #tpu.memory_space<vmem>>, vector<1x1x32xf32>
    %182 = vector.shape_cast %181 : vector<1x1x32xf32> to vector<1x32xf32>
    %c0_80 = arith.constant 0 : index
    %c0_81 = arith.constant 0 : index
    %c0_82 = arith.constant 0 : index
    %183 = vector.load %arg17[%c0_80, %c0_81, %c0_82] : memref<2x1x32xf32, #tpu.memory_space<vmem>>, vector<1x1x32xf32>
    %184 = vector.shape_cast %183 : vector<1x1x32xf32> to vector<1x32xf32>
    %cst_83 = arith.constant dense<0.000000e+00> : vector<16xf32>
    %185 = vector.multi_reduction <add>, %180, %cst_83 [1] : vector<16x32xf32> to vector<16xf32>
    %186 = vector.shape_cast %185 : vector<16xf32> to vector<16x1xf32>
    %cst_84 = arith.constant 3.200000e+01 : f32
    %187 = vector.broadcast %cst_84 : f32 to vector<16x1xf32>
    %188 = arith.divf %186, %187 : vector<16x1xf32>
    %189 = vector.broadcast %188 : vector<16x1xf32> to vector<16x32xf32>
    %190 = arith.subf %180, %189 : vector<16x32xf32>
    %191 = arith.mulf %190, %190 : vector<16x32xf32>
    %cst_85 = arith.constant dense<0.000000e+00> : vector<16xf32>
    %192 = vector.multi_reduction <add>, %191, %cst_85 [1] : vector<16x32xf32> to vector<16xf32>
    %193 = vector.shape_cast %192 : vector<16xf32> to vector<16x1xf32>
    %cst_86 = arith.constant 3.200000e+01 : f32
    %194 = vector.broadcast %cst_86 : f32 to vector<16x1xf32>
    %195 = arith.divf %193, %194 : vector<16x1xf32>
    %cst_87 = arith.constant 9.99999996E-13 : f32
    %196 = vector.broadcast %cst_87 : f32 to vector<16x1xf32>
    %197 = arith.addf %195, %196 : vector<16x1xf32>
    %198 = math.rsqrt %197 : vector<16x1xf32>
    %199 = vector.broadcast %188 : vector<16x1xf32> to vector<16x32xf32>
    %200 = arith.subf %180, %199 : vector<16x32xf32>
    %201 = vector.broadcast %198 : vector<16x1xf32> to vector<16x32xf32>
    %202 = arith.mulf %200, %201 : vector<16x32xf32>
    %203 = vector.broadcast %182 : vector<1x32xf32> to vector<16x32xf32>
    %204 = arith.mulf %202, %203 : vector<16x32xf32>
    %205 = vector.broadcast %184 : vector<1x32xf32> to vector<16x32xf32>
    %206 = arith.addf %204, %205 : vector<16x32xf32>
    %c1 = arith.constant 1 : index
    %c0_88 = arith.constant 0 : index
    %c0_89 = arith.constant 0 : index
    %207 = vector.load %arg6[%c1, %c0_88, %c0_89] : memref<2x32x96xf32, #tpu.memory_space<vmem>>, vector<1x32x96xf32>
    %208 = vector.shape_cast %207 : vector<1x32x96xf32> to vector<32x96xf32>
    %cst_90 = arith.constant dense<0.000000e+00> : vector<16x96xf32>
    %209 = tpu.matmul %206, %208, %cst_90 {dimension_numbers = #tpu.dot_dimension_numbers<[1], [0], [0], [1], [0, 0, 1, 1], [], []>} : vector<16x32xf32>, vector<32x96xf32>, vector<16x96xf32> -> vector<16x96xf32>
    %c1_91 = arith.constant 1 : index
    %c0_92 = arith.constant 0 : index
    %c0_93 = arith.constant 0 : index
    %210 = vector.load %arg7[%c1_91, %c0_92, %c0_93] : memref<2x1x96xf32, #tpu.memory_space<vmem>>, vector<1x1x96xf32>
    %211 = vector.shape_cast %210 : vector<1x1x96xf32> to vector<1x96xf32>
    %212 = vector.broadcast %211 : vector<1x96xf32> to vector<16x96xf32>
    %213 = arith.addf %209, %212 : vector<16x96xf32>
    %214 = vector.extract_strided_slice %213 {offsets = [0, 0], sizes = [16, 32], strides = [1, 1]} : vector<16x96xf32> to vector<16x32xf32>
    %215 = vector.extract_strided_slice %213 {offsets = [0, 32], sizes = [16, 32], strides = [1, 1]} : vector<16x96xf32> to vector<16x32xf32>
    %216 = vector.extract_strided_slice %213 {offsets = [0, 64], sizes = [16, 32], strides = [1, 1]} : vector<16x96xf32> to vector<16x32xf32>
    %217 = vector.extract_strided_slice %214 {offsets = [0, 0], sizes = [8, 16], strides = [1, 1]} : vector<16x32xf32> to vector<8x16xf32>
    %218 = vector.extract_strided_slice %215 {offsets = [0, 0], sizes = [8, 16], strides = [1, 1]} : vector<16x32xf32> to vector<8x16xf32>
    %219 = vector.extract_strided_slice %216 {offsets = [0, 0], sizes = [8, 16], strides = [1, 1]} : vector<16x32xf32> to vector<8x16xf32>
    %220 = tpu.transpose %218, [1, 0] : vector<8x16xf32> -> vector<16x8xf32>
    %cst_94 = arith.constant dense<0.000000e+00> : vector<8x8xf32>
    %221 = tpu.matmul %217, %220, %cst_94 {dimension_numbers = #tpu.dot_dimension_numbers<[1], [0], [0], [1], [0, 0, 1, 1], [], []>} : vector<8x16xf32>, vector<16x8xf32>, vector<8x8xf32> -> vector<8x8xf32>
    %cst_95 = arith.constant 2.500000e-01 : f32
    %222 = vector.broadcast %cst_95 : f32 to vector<8x8xf32>
    %223 = arith.mulf %221, %222 : vector<8x8xf32>
    %cst_96 = arith.constant dense<0xFF800000> : vector<8xf32>
    %224 = vector.multi_reduction <maximumf>, %223, %cst_96 [1] : vector<8x8xf32> to vector<8xf32>
    %225 = vector.shape_cast %224 : vector<8xf32> to vector<8x1xf32>
    %226 = vector.broadcast %225 : vector<8x1xf32> to vector<8x8xf32>
    %227 = arith.subf %223, %226 : vector<8x8xf32>
    %228 = math.exp %227 : vector<8x8xf32>
    %cst_97 = arith.constant dense<0.000000e+00> : vector<8xf32>
    %229 = vector.multi_reduction <add>, %228, %cst_97 [1] : vector<8x8xf32> to vector<8xf32>
    %230 = vector.shape_cast %229 : vector<8xf32> to vector<8x1xf32>
    %231 = tpu.reciprocal %230 {approx = true} : vector<8x1xf32> -> vector<8x1xf32>
    %232 = vector.broadcast %231 : vector<8x1xf32> to vector<8x8xf32>
    %233 = arith.mulf %228, %232 : vector<8x8xf32>
    %cst_98 = arith.constant dense<0.000000e+00> : vector<8x16xf32>
    %234 = tpu.matmul %233, %219, %cst_98 {dimension_numbers = #tpu.dot_dimension_numbers<[1], [0], [0], [1], [0, 0, 1, 1], [], []>} : vector<8x8xf32>, vector<8x16xf32>, vector<8x16xf32> -> vector<8x16xf32>
    %235 = vector.extract_strided_slice %214 {offsets = [0, 16], sizes = [8, 16], strides = [1, 1]} : vector<16x32xf32> to vector<8x16xf32>
    %236 = vector.extract_strided_slice %215 {offsets = [0, 16], sizes = [8, 16], strides = [1, 1]} : vector<16x32xf32> to vector<8x16xf32>
    %237 = vector.extract_strided_slice %216 {offsets = [0, 16], sizes = [8, 16], strides = [1, 1]} : vector<16x32xf32> to vector<8x16xf32>
    %238 = tpu.transpose %236, [1, 0] : vector<8x16xf32> -> vector<16x8xf32>
    %cst_99 = arith.constant dense<0.000000e+00> : vector<8x8xf32>
    %239 = tpu.matmul %235, %238, %cst_99 {dimension_numbers = #tpu.dot_dimension_numbers<[1], [0], [0], [1], [0, 0, 1, 1], [], []>} : vector<8x16xf32>, vector<16x8xf32>, vector<8x8xf32> -> vector<8x8xf32>
    %cst_100 = arith.constant 2.500000e-01 : f32
    %240 = vector.broadcast %cst_100 : f32 to vector<8x8xf32>
    %241 = arith.mulf %239, %240 : vector<8x8xf32>
    %cst_101 = arith.constant dense<0xFF800000> : vector<8xf32>
    %242 = vector.multi_reduction <maximumf>, %241, %cst_101 [1] : vector<8x8xf32> to vector<8xf32>
    %243 = vector.shape_cast %242 : vector<8xf32> to vector<8x1xf32>
    %244 = vector.broadcast %243 : vector<8x1xf32> to vector<8x8xf32>
    %245 = arith.subf %241, %244 : vector<8x8xf32>
    %246 = math.exp %245 : vector<8x8xf32>
    %cst_102 = arith.constant dense<0.000000e+00> : vector<8xf32>
    %247 = vector.multi_reduction <add>, %246, %cst_102 [1] : vector<8x8xf32> to vector<8xf32>
    %248 = vector.shape_cast %247 : vector<8xf32> to vector<8x1xf32>
    %249 = tpu.reciprocal %248 {approx = true} : vector<8x1xf32> -> vector<8x1xf32>
    %250 = vector.broadcast %249 : vector<8x1xf32> to vector<8x8xf32>
    %251 = arith.mulf %246, %250 : vector<8x8xf32>
    %cst_103 = arith.constant dense<0.000000e+00> : vector<8x16xf32>
    %252 = tpu.matmul %251, %237, %cst_103 {dimension_numbers = #tpu.dot_dimension_numbers<[1], [0], [0], [1], [0, 0, 1, 1], [], []>} : vector<8x8xf32>, vector<8x16xf32>, vector<8x16xf32> -> vector<8x16xf32>
    %253 = tpu.concatenate %234, %252 in 1 : vector<8x16xf32>, vector<8x16xf32> -> vector<8x32xf32>
    %254 = vector.extract_strided_slice %214 {offsets = [8, 0], sizes = [8, 16], strides = [1, 1]} : vector<16x32xf32> to vector<8x16xf32>
    %255 = vector.extract_strided_slice %215 {offsets = [8, 0], sizes = [8, 16], strides = [1, 1]} : vector<16x32xf32> to vector<8x16xf32>
    %256 = vector.extract_strided_slice %216 {offsets = [8, 0], sizes = [8, 16], strides = [1, 1]} : vector<16x32xf32> to vector<8x16xf32>
    %257 = tpu.transpose %255, [1, 0] : vector<8x16xf32> -> vector<16x8xf32>
    %cst_104 = arith.constant dense<0.000000e+00> : vector<8x8xf32>
    %258 = tpu.matmul %254, %257, %cst_104 {dimension_numbers = #tpu.dot_dimension_numbers<[1], [0], [0], [1], [0, 0, 1, 1], [], []>} : vector<8x16xf32>, vector<16x8xf32>, vector<8x8xf32> -> vector<8x8xf32>
    %cst_105 = arith.constant 2.500000e-01 : f32
    %259 = vector.broadcast %cst_105 : f32 to vector<8x8xf32>
    %260 = arith.mulf %258, %259 : vector<8x8xf32>
    %cst_106 = arith.constant dense<0xFF800000> : vector<8xf32>
    %261 = vector.multi_reduction <maximumf>, %260, %cst_106 [1] : vector<8x8xf32> to vector<8xf32>
    %262 = vector.shape_cast %261 : vector<8xf32> to vector<8x1xf32>
    %263 = vector.broadcast %262 : vector<8x1xf32> to vector<8x8xf32>
    %264 = arith.subf %260, %263 : vector<8x8xf32>
    %265 = math.exp %264 : vector<8x8xf32>
    %cst_107 = arith.constant dense<0.000000e+00> : vector<8xf32>
    %266 = vector.multi_reduction <add>, %265, %cst_107 [1] : vector<8x8xf32> to vector<8xf32>
    %267 = vector.shape_cast %266 : vector<8xf32> to vector<8x1xf32>
    %268 = tpu.reciprocal %267 {approx = true} : vector<8x1xf32> -> vector<8x1xf32>
    %269 = vector.broadcast %268 : vector<8x1xf32> to vector<8x8xf32>
    %270 = arith.mulf %265, %269 : vector<8x8xf32>
    %cst_108 = arith.constant dense<0.000000e+00> : vector<8x16xf32>
    %271 = tpu.matmul %270, %256, %cst_108 {dimension_numbers = #tpu.dot_dimension_numbers<[1], [0], [0], [1], [0, 0, 1, 1], [], []>} : vector<8x8xf32>, vector<8x16xf32>, vector<8x16xf32> -> vector<8x16xf32>
    %272 = vector.extract_strided_slice %214 {offsets = [8, 16], sizes = [8, 16], strides = [1, 1]} : vector<16x32xf32> to vector<8x16xf32>
    %273 = vector.extract_strided_slice %215 {offsets = [8, 16], sizes = [8, 16], strides = [1, 1]} : vector<16x32xf32> to vector<8x16xf32>
    %274 = vector.extract_strided_slice %216 {offsets = [8, 16], sizes = [8, 16], strides = [1, 1]} : vector<16x32xf32> to vector<8x16xf32>
    %275 = tpu.transpose %273, [1, 0] : vector<8x16xf32> -> vector<16x8xf32>
    %cst_109 = arith.constant dense<0.000000e+00> : vector<8x8xf32>
    %276 = tpu.matmul %272, %275, %cst_109 {dimension_numbers = #tpu.dot_dimension_numbers<[1], [0], [0], [1], [0, 0, 1, 1], [], []>} : vector<8x16xf32>, vector<16x8xf32>, vector<8x8xf32> -> vector<8x8xf32>
    %cst_110 = arith.constant 2.500000e-01 : f32
    %277 = vector.broadcast %cst_110 : f32 to vector<8x8xf32>
    %278 = arith.mulf %276, %277 : vector<8x8xf32>
    %cst_111 = arith.constant dense<0xFF800000> : vector<8xf32>
    %279 = vector.multi_reduction <maximumf>, %278, %cst_111 [1] : vector<8x8xf32> to vector<8xf32>
    %280 = vector.shape_cast %279 : vector<8xf32> to vector<8x1xf32>
    %281 = vector.broadcast %280 : vector<8x1xf32> to vector<8x8xf32>
    %282 = arith.subf %278, %281 : vector<8x8xf32>
    %283 = math.exp %282 : vector<8x8xf32>
    %cst_112 = arith.constant dense<0.000000e+00> : vector<8xf32>
    %284 = vector.multi_reduction <add>, %283, %cst_112 [1] : vector<8x8xf32> to vector<8xf32>
    %285 = vector.shape_cast %284 : vector<8xf32> to vector<8x1xf32>
    %286 = tpu.reciprocal %285 {approx = true} : vector<8x1xf32> -> vector<8x1xf32>
    %287 = vector.broadcast %286 : vector<8x1xf32> to vector<8x8xf32>
    %288 = arith.mulf %283, %287 : vector<8x8xf32>
    %cst_113 = arith.constant dense<0.000000e+00> : vector<8x16xf32>
    %289 = tpu.matmul %288, %274, %cst_113 {dimension_numbers = #tpu.dot_dimension_numbers<[1], [0], [0], [1], [0, 0, 1, 1], [], []>} : vector<8x8xf32>, vector<8x16xf32>, vector<8x16xf32> -> vector<8x16xf32>
    %290 = tpu.concatenate %271, %289 in 1 : vector<8x16xf32>, vector<8x16xf32> -> vector<8x32xf32>
    %291 = tpu.concatenate %253, %290 in 0 : vector<8x32xf32>, vector<8x32xf32> -> vector<16x32xf32>
    %c1_114 = arith.constant 1 : index
    %c0_115 = arith.constant 0 : index
    %c0_116 = arith.constant 0 : index
    %292 = vector.load %arg8[%c1_114, %c0_115, %c0_116] : memref<2x32x32xf32, #tpu.memory_space<vmem>>, vector<1x32x32xf32>
    %293 = vector.shape_cast %292 : vector<1x32x32xf32> to vector<32x32xf32>
    %cst_117 = arith.constant dense<0.000000e+00> : vector<16x32xf32>
    %294 = tpu.matmul %291, %293, %cst_117 {dimension_numbers = #tpu.dot_dimension_numbers<[1], [0], [0], [1], [0, 0, 1, 1], [], []>} : vector<16x32xf32>, vector<32x32xf32>, vector<16x32xf32> -> vector<16x32xf32>
    %c1_118 = arith.constant 1 : index
    %c0_119 = arith.constant 0 : index
    %c0_120 = arith.constant 0 : index
    %295 = vector.load %arg9[%c1_118, %c0_119, %c0_120] : memref<2x1x32xf32, #tpu.memory_space<vmem>>, vector<1x1x32xf32>
    %296 = vector.shape_cast %295 : vector<1x1x32xf32> to vector<1x32xf32>
    %297 = vector.broadcast %296 : vector<1x32xf32> to vector<16x32xf32>
    %298 = arith.addf %294, %297 : vector<16x32xf32>
    %299 = arith.addf %298, %206 : vector<16x32xf32>
    %c1_121 = arith.constant 1 : index
    %c0_122 = arith.constant 0 : index
    %c0_123 = arith.constant 0 : index
    %300 = vector.load %arg10[%c1_121, %c0_122, %c0_123] : memref<2x1x32xf32, #tpu.memory_space<vmem>>, vector<1x1x32xf32>
    %301 = vector.shape_cast %300 : vector<1x1x32xf32> to vector<1x32xf32>
    %c1_124 = arith.constant 1 : index
    %c0_125 = arith.constant 0 : index
    %c0_126 = arith.constant 0 : index
    %302 = vector.load %arg11[%c1_124, %c0_125, %c0_126] : memref<2x1x32xf32, #tpu.memory_space<vmem>>, vector<1x1x32xf32>
    %303 = vector.shape_cast %302 : vector<1x1x32xf32> to vector<1x32xf32>
    %cst_127 = arith.constant dense<0.000000e+00> : vector<16xf32>
    %304 = vector.multi_reduction <add>, %299, %cst_127 [1] : vector<16x32xf32> to vector<16xf32>
    %305 = vector.shape_cast %304 : vector<16xf32> to vector<16x1xf32>
    %cst_128 = arith.constant 3.200000e+01 : f32
    %306 = vector.broadcast %cst_128 : f32 to vector<16x1xf32>
    %307 = arith.divf %305, %306 : vector<16x1xf32>
    %308 = vector.broadcast %307 : vector<16x1xf32> to vector<16x32xf32>
    %309 = arith.subf %299, %308 : vector<16x32xf32>
    %310 = arith.mulf %309, %309 : vector<16x32xf32>
    %cst_129 = arith.constant dense<0.000000e+00> : vector<16xf32>
    %311 = vector.multi_reduction <add>, %310, %cst_129 [1] : vector<16x32xf32> to vector<16xf32>
    %312 = vector.shape_cast %311 : vector<16xf32> to vector<16x1xf32>
    %cst_130 = arith.constant 3.200000e+01 : f32
    %313 = vector.broadcast %cst_130 : f32 to vector<16x1xf32>
    %314 = arith.divf %312, %313 : vector<16x1xf32>
    %cst_131 = arith.constant 9.99999996E-13 : f32
    %315 = vector.broadcast %cst_131 : f32 to vector<16x1xf32>
    %316 = arith.addf %314, %315 : vector<16x1xf32>
    %317 = math.rsqrt %316 : vector<16x1xf32>
    %318 = vector.broadcast %307 : vector<16x1xf32> to vector<16x32xf32>
    %319 = arith.subf %299, %318 : vector<16x32xf32>
    %320 = vector.broadcast %317 : vector<16x1xf32> to vector<16x32xf32>
    %321 = arith.mulf %319, %320 : vector<16x32xf32>
    %322 = vector.broadcast %301 : vector<1x32xf32> to vector<16x32xf32>
    %323 = arith.mulf %321, %322 : vector<16x32xf32>
    %324 = vector.broadcast %303 : vector<1x32xf32> to vector<16x32xf32>
    %325 = arith.addf %323, %324 : vector<16x32xf32>
    %c1_132 = arith.constant 1 : index
    %c0_133 = arith.constant 0 : index
    %c0_134 = arith.constant 0 : index
    %326 = vector.load %arg12[%c1_132, %c0_133, %c0_134] : memref<2x32x64xf32, #tpu.memory_space<vmem>>, vector<1x32x64xf32>
    %327 = vector.shape_cast %326 : vector<1x32x64xf32> to vector<32x64xf32>
    %cst_135 = arith.constant dense<0.000000e+00> : vector<16x64xf32>
    %328 = tpu.matmul %325, %327, %cst_135 {dimension_numbers = #tpu.dot_dimension_numbers<[1], [0], [0], [1], [0, 0, 1, 1], [], []>} : vector<16x32xf32>, vector<32x64xf32>, vector<16x64xf32> -> vector<16x64xf32>
    %c1_136 = arith.constant 1 : index
    %c0_137 = arith.constant 0 : index
    %c0_138 = arith.constant 0 : index
    %329 = vector.load %arg13[%c1_136, %c0_137, %c0_138] : memref<2x1x64xf32, #tpu.memory_space<vmem>>, vector<1x1x64xf32>
    %330 = vector.shape_cast %329 : vector<1x1x64xf32> to vector<1x64xf32>
    %331 = vector.broadcast %330 : vector<1x64xf32> to vector<16x64xf32>
    %332 = arith.addf %328, %331 : vector<16x64xf32>
    %cst_139 = arith.constant 5.000000e-01 : f32
    %333 = vector.broadcast %cst_139 : f32 to vector<16x64xf32>
    %334 = arith.mulf %333, %332 : vector<16x64xf32>
    %cst_140 = arith.constant 4.471500e-02 : f32
    %335 = vector.broadcast %cst_140 : f32 to vector<16x64xf32>
    %336 = arith.mulf %335, %332 : vector<16x64xf32>
    %337 = arith.mulf %336, %332 : vector<16x64xf32>
    %338 = arith.mulf %337, %332 : vector<16x64xf32>
    %339 = arith.addf %332, %338 : vector<16x64xf32>
    %cst_141 = arith.constant 0.797884583 : f32
    %340 = vector.broadcast %cst_141 : f32 to vector<16x64xf32>
    %341 = arith.mulf %340, %339 : vector<16x64xf32>
    %342 = math.tanh %341 : vector<16x64xf32>
    %cst_142 = arith.constant 1.000000e+00 : f32
    %343 = vector.broadcast %cst_142 : f32 to vector<16x64xf32>
    %344 = arith.addf %343, %342 : vector<16x64xf32>
    %345 = arith.mulf %334, %344 : vector<16x64xf32>
    %c1_143 = arith.constant 1 : index
    %c0_144 = arith.constant 0 : index
    %c0_145 = arith.constant 0 : index
    %346 = vector.load %arg14[%c1_143, %c0_144, %c0_145] : memref<2x64x32xf32, #tpu.memory_space<vmem>>, vector<1x64x32xf32>
    %347 = vector.shape_cast %346 : vector<1x64x32xf32> to vector<64x32xf32>
    %cst_146 = arith.constant dense<0.000000e+00> : vector<16x32xf32>
    %348 = tpu.matmul %345, %347, %cst_146 {dimension_numbers = #tpu.dot_dimension_numbers<[1], [0], [0], [1], [0, 0, 1, 1], [], []>} : vector<16x64xf32>, vector<64x32xf32>, vector<16x32xf32> -> vector<16x32xf32>
    %c1_147 = arith.constant 1 : index
    %c0_148 = arith.constant 0 : index
    %c0_149 = arith.constant 0 : index
    %349 = vector.load %arg15[%c1_147, %c0_148, %c0_149] : memref<2x1x32xf32, #tpu.memory_space<vmem>>, vector<1x1x32xf32>
    %350 = vector.shape_cast %349 : vector<1x1x32xf32> to vector<1x32xf32>
    %351 = vector.broadcast %350 : vector<1x32xf32> to vector<16x32xf32>
    %352 = arith.addf %348, %351 : vector<16x32xf32>
    %353 = arith.addf %352, %325 : vector<16x32xf32>
    %c1_150 = arith.constant 1 : index
    %c0_151 = arith.constant 0 : index
    %c0_152 = arith.constant 0 : index
    %354 = vector.load %arg16[%c1_150, %c0_151, %c0_152] : memref<2x1x32xf32, #tpu.memory_space<vmem>>, vector<1x1x32xf32>
    %355 = vector.shape_cast %354 : vector<1x1x32xf32> to vector<1x32xf32>
    %c1_153 = arith.constant 1 : index
    %c0_154 = arith.constant 0 : index
    %c0_155 = arith.constant 0 : index
    %356 = vector.load %arg17[%c1_153, %c0_154, %c0_155] : memref<2x1x32xf32, #tpu.memory_space<vmem>>, vector<1x1x32xf32>
    %357 = vector.shape_cast %356 : vector<1x1x32xf32> to vector<1x32xf32>
    %cst_156 = arith.constant dense<0.000000e+00> : vector<16xf32>
    %358 = vector.multi_reduction <add>, %353, %cst_156 [1] : vector<16x32xf32> to vector<16xf32>
    %359 = vector.shape_cast %358 : vector<16xf32> to vector<16x1xf32>
    %cst_157 = arith.constant 3.200000e+01 : f32
    %360 = vector.broadcast %cst_157 : f32 to vector<16x1xf32>
    %361 = arith.divf %359, %360 : vector<16x1xf32>
    %362 = vector.broadcast %361 : vector<16x1xf32> to vector<16x32xf32>
    %363 = arith.subf %353, %362 : vector<16x32xf32>
    %364 = arith.mulf %363, %363 : vector<16x32xf32>
    %cst_158 = arith.constant dense<0.000000e+00> : vector<16xf32>
    %365 = vector.multi_reduction <add>, %364, %cst_158 [1] : vector<16x32xf32> to vector<16xf32>
    %366 = vector.shape_cast %365 : vector<16xf32> to vector<16x1xf32>
    %cst_159 = arith.constant 3.200000e+01 : f32
    %367 = vector.broadcast %cst_159 : f32 to vector<16x1xf32>
    %368 = arith.divf %366, %367 : vector<16x1xf32>
    %cst_160 = arith.constant 9.99999996E-13 : f32
    %369 = vector.broadcast %cst_160 : f32 to vector<16x1xf32>
    %370 = arith.addf %368, %369 : vector<16x1xf32>
    %371 = math.rsqrt %370 : vector<16x1xf32>
    %372 = vector.broadcast %361 : vector<16x1xf32> to vector<16x32xf32>
    %373 = arith.subf %353, %372 : vector<16x32xf32>
    %374 = vector.broadcast %371 : vector<16x1xf32> to vector<16x32xf32>
    %375 = arith.mulf %373, %374 : vector<16x32xf32>
    %376 = vector.broadcast %355 : vector<1x32xf32> to vector<16x32xf32>
    %377 = arith.mulf %375, %376 : vector<16x32xf32>
    %378 = vector.broadcast %357 : vector<1x32xf32> to vector<16x32xf32>
    %379 = arith.addf %377, %378 : vector<16x32xf32>
    %380 = vector.extract_strided_slice %379 {offsets = [0, 0], sizes = [1, 32], strides = [1, 1]} : vector<16x32xf32> to vector<1x32xf32>
    %381 = vector.extract_strided_slice %379 {offsets = [8, 0], sizes = [1, 32], strides = [1, 1]} : vector<16x32xf32> to vector<1x32xf32>
    %382 = tpu.concatenate %380, %381 in 0 : vector<1x32xf32>, vector<1x32xf32> -> vector<2x32xf32>
    %c0_161 = arith.constant 0 : index
    %c0_162 = arith.constant 0 : index
    %383 = vector.load %arg18[%c0_161, %c0_162] : memref<32x32xf32, #tpu.memory_space<vmem>>, vector<32x32xf32>
    %cst_163 = arith.constant dense<0.000000e+00> : vector<2x32xf32>
    %384 = tpu.matmul %382, %383, %cst_163 {dimension_numbers = #tpu.dot_dimension_numbers<[1], [0], [0], [1], [0, 0, 1, 1], [], []>} : vector<2x32xf32>, vector<32x32xf32>, vector<2x32xf32> -> vector<2x32xf32>
    %c0_164 = arith.constant 0 : index
    %c0_165 = arith.constant 0 : index
    %385 = vector.load %arg19[%c0_164, %c0_165] : memref<1x32xf32, #tpu.memory_space<vmem>>, vector<1x32xf32>
    %386 = vector.broadcast %385 : vector<1x32xf32> to vector<2x32xf32>
    %387 = arith.addf %384, %386 : vector<2x32xf32>
    %388 = math.tanh %387 : vector<2x32xf32>
    %c0_166 = arith.constant 0 : index
    %c0_167 = arith.constant 0 : index
    %389 = vector.load %arg20[%c0_166, %c0_167] : memref<32x2xf32, #tpu.memory_space<vmem>>, vector<32x2xf32>
    %cst_168 = arith.constant dense<0.000000e+00> : vector<2x2xf32>
    %390 = tpu.matmul %388, %389, %cst_168 {dimension_numbers = #tpu.dot_dimension_numbers<[1], [0], [0], [1], [0, 0, 1, 1], [], []>} : vector<2x32xf32>, vector<32x2xf32>, vector<2x2xf32> -> vector<2x2xf32>
    %c0_169 = arith.constant 0 : index
    %c0_170 = arith.constant 0 : index
    %391 = vector.load %arg21[%c0_169, %c0_170] : memref<1x2xf32, #tpu.memory_space<vmem>>, vector<1x2xf32>
    %392 = vector.broadcast %391 : vector<1x2xf32> to vector<2x2xf32>
    %393 = arith.addf %390, %392 : vector<2x2xf32>
    %c0_171 = arith.constant 0 : index
    %c0_172 = arith.constant 0 : index
    %394 = vector.load %arg22[%c0_171, %c0_172] : memref<2x2xf32, #tpu.memory_space<vmem>>, vector<2x2xf32>
    tpu.vector_store %arg22[%c0_171, %c0_172], %393 {strides = array<i32>} : memref<2x2xf32, #tpu.memory_space<vmem>>, vector<2x2xf32>,
    return
  }
  func.func @transform_0(%arg0: i32) -> (i32, i32) {
    %c0_i32 = arith.constant 0 : i32
    %c0_i32_0 = arith.constant 0 : i32
    %c0_i32_1 = arith.constant 0 : i32
    return %c0_i32, %c0_i32_0 : i32, i32
  }
  func.func @transform_1(%arg0: i32) -> (i32, i32) {
    %c0_i32 = arith.constant 0 : i32
    %c0_i32_0 = arith.constant 0 : i32
    %c0_i32_1 = arith.constant 0 : i32
    return %c0_i32, %c0_i32_0 : i32, i32
  }
  func.func @transform_2(%arg0: i32) -> (i32, i32) {
    %c0_i32 = arith.constant 0 : i32
    %c0_i32_0 = arith.constant 0 : i32
    %c0_i32_1 = arith.constant 0 : i32
    return %c0_i32, %c0_i32_0 : i32, i32
  }
  func.func @transform_3(%arg0: i32) -> (i32, i32) {
    %c0_i32 = arith.constant 0 : i32
    %c0_i32_0 = arith.constant 0 : i32
    %c0_i32_1 = arith.constant 0 : i32
    return %c0_i32, %c0_i32_0 : i32, i32
  }
  func.func @transform_4(%arg0: i32) -> (i32, i32) {
    %c0_i32 = arith.constant 0 : i32
    %c0_i32_0 = arith.constant 0 : i32
    %c0_i32_1 = arith.constant 0 : i32
    return %c0_i32, %c0_i32_0 : i32, i32
  }
  func.func @transform_5(%arg0: i32) -> (i32, i32, i32) {
    %c0_i32 = arith.constant 0 : i32
    %c0_i32_0 = arith.constant 0 : i32
    %c0_i32_1 = arith.constant 0 : i32
    %c0_i32_2 = arith.constant 0 : i32
    return %c0_i32, %c0_i32_0, %c0_i32_1 : i32, i32, i32
  }
  func.func @transform_6(%arg0: i32) -> (i32, i32, i32) {
    %c0_i32 = arith.constant 0 : i32
    %c0_i32_0 = arith.constant 0 : i32
    %c0_i32_1 = arith.constant 0 : i32
    %c0_i32_2 = arith.constant 0 : i32
    return %c0_i32, %c0_i32_0, %c0_i32_1 : i32, i32, i32
  }
  func.func @transform_7(%arg0: i32) -> (i32, i32, i32) {
    %c0_i32 = arith.constant 0 : i32
    %c0_i32_0 = arith.constant 0 : i32
    %c0_i32_1 = arith.constant 0 : i32
    %c0_i32_2 = arith.constant 0 : i32
    return %c0_i32, %c0_i32_0, %c0_i32_1 : i32, i32, i32
  }
  func.func @transform_8(%arg0: i32) -> (i32, i32, i32) {
    %c0_i32 = arith.constant 0 : i32
    %c0_i32_0 = arith.constant 0 : i32
    %c0_i32_1 = arith.constant 0 : i32
    %c0_i32_2 = arith.constant 0 : i32
    return %c0_i32, %c0_i32_0, %c0_i32_1 : i32, i32, i32
  }
  func.func @transform_9(%arg0: i32) -> (i32, i32, i32) {
    %c0_i32 = arith.constant 0 : i32
    %c0_i32_0 = arith.constant 0 : i32
    %c0_i32_1 = arith.constant 0 : i32
    %c0_i32_2 = arith.constant 0 : i32
    return %c0_i32, %c0_i32_0, %c0_i32_1 : i32, i32, i32
  }
  func.func @transform_10(%arg0: i32) -> (i32, i32, i32) {
    %c0_i32 = arith.constant 0 : i32
    %c0_i32_0 = arith.constant 0 : i32
    %c0_i32_1 = arith.constant 0 : i32
    %c0_i32_2 = arith.constant 0 : i32
    return %c0_i32, %c0_i32_0, %c0_i32_1 : i32, i32, i32
  }
  func.func @transform_11(%arg0: i32) -> (i32, i32, i32) {
    %c0_i32 = arith.constant 0 : i32
    %c0_i32_0 = arith.constant 0 : i32
    %c0_i32_1 = arith.constant 0 : i32
    %c0_i32_2 = arith.constant 0 : i32
    return %c0_i32, %c0_i32_0, %c0_i32_1 : i32, i32, i32
  }
  func.func @transform_12(%arg0: i32) -> (i32, i32, i32) {
    %c0_i32 = arith.constant 0 : i32
    %c0_i32_0 = arith.constant 0 : i32
    %c0_i32_1 = arith.constant 0 : i32
    %c0_i32_2 = arith.constant 0 : i32
    return %c0_i32, %c0_i32_0, %c0_i32_1 : i32, i32, i32
  }
  func.func @transform_13(%arg0: i32) -> (i32, i32, i32) {
    %c0_i32 = arith.constant 0 : i32
    %c0_i32_0 = arith.constant 0 : i32
    %c0_i32_1 = arith.constant 0 : i32
    %c0_i32_2 = arith.constant 0 : i32
    return %c0_i32, %c0_i32_0, %c0_i32_1 : i32, i32, i32
  }
  func.func @transform_14(%arg0: i32) -> (i32, i32, i32) {
    %c0_i32 = arith.constant 0 : i32
    %c0_i32_0 = arith.constant 0 : i32
    %c0_i32_1 = arith.constant 0 : i32
    %c0_i32_2 = arith.constant 0 : i32
    return %c0_i32, %c0_i32_0, %c0_i32_1 : i32, i32, i32
  }
  func.func @transform_15(%arg0: i32) -> (i32, i32, i32) {
    %c0_i32 = arith.constant 0 : i32
    %c0_i32_0 = arith.constant 0 : i32
    %c0_i32_1 = arith.constant 0 : i32
    %c0_i32_2 = arith.constant 0 : i32
    return %c0_i32, %c0_i32_0, %c0_i32_1 : i32, i32, i32
  }
  func.func @transform_16(%arg0: i32) -> (i32, i32, i32) {
    %c0_i32 = arith.constant 0 : i32
    %c0_i32_0 = arith.constant 0 : i32
    %c0_i32_1 = arith.constant 0 : i32
    %c0_i32_2 = arith.constant 0 : i32
    return %c0_i32, %c0_i32_0, %c0_i32_1 : i32, i32, i32
  }
  func.func @transform_17(%arg0: i32) -> (i32, i32) {
    %c0_i32 = arith.constant 0 : i32
    %c0_i32_0 = arith.constant 0 : i32
    %c0_i32_1 = arith.constant 0 : i32
    return %c0_i32, %c0_i32_0 : i32, i32
  }
  func.func @transform_18(%arg0: i32) -> (i32, i32) {
    %c0_i32 = arith.constant 0 : i32
    %c0_i32_0 = arith.constant 0 : i32
    %c0_i32_1 = arith.constant 0 : i32
    return %c0_i32, %c0_i32_0 : i32, i32
  }
  func.func @transform_19(%arg0: i32) -> (i32, i32) {
    %c0_i32 = arith.constant 0 : i32
    %c0_i32_0 = arith.constant 0 : i32
    %c0_i32_1 = arith.constant 0 : i32
    return %c0_i32, %c0_i32_0 : i32, i32
  }
  func.func @transform_20(%arg0: i32) -> (i32, i32) {
    %c0_i32 = arith.constant 0 : i32
    %c0_i32_0 = arith.constant 0 : i32
    %c0_i32_1 = arith.constant 0 : i32
    return %c0_i32, %c0_i32_0 : i32, i32
  }
  func.func @transform_21(%arg0: i32) -> (i32, i32) {
    %c0_i32 = arith.constant 0 : i32
    %c0_i32_0 = arith.constant 0 : i32
    %c0_i32_1 = arith.constant 0 : i32
    return %c0_i32, %c0_i32_0 : i32, i32
  }
}

</mosaic_0001>

<bundles_post_ra>
// kernel: hf_language_forward.1
= control target key start
LH: loop header
LB: loop body
LE: loop exit
PB: predicated region body
PF: predicated region fallthrough
CT: control target
= control target key end

     0   :  { %s2169_s0 = inlined_call_operand.vmem [shape: s32[16,1], index: 0, kind: input, shape index: {}]   ;;  %s2170_s1 = inlined_call_operand.vmem [shape: f32[128,32], index: 1, kind: input, shape index: {}]   ;;  %s2171_s2 = inlined_call_operand.vmem [shape: f32[16,32], index: 2, kind: input, shape index: {}]   ;;  %s2172_s3 = inlined_call_operand.vmem [shape: f32[1,32], index: 3, kind: input, shape index: {}]   ;;  %s2173_s4 = inlined_call_operand.vmem [shape: f32[1,32], index: 4, kind: input, shape index: {}]   ;;  %s2174_s5 = inlined_call_operand.vmem [shape: f32[2,32,96], index: 5, kind: input, shape index: {}]   ;;  %s2175_s6 = inlined_call_operand.vmem [shape: f32[2,1,96], index: 6, kind: input, shape index: {}]   ;;  %s2176_s7 = inlined_call_operand.vmem [shape: f32[2,32,32], index: 7, kind: input, shape index: {}]   ;;  %s2177_s8 = inlined_call_operand.vmem [shape: f32[2,1,32], index: 8, kind: input, shape index: {}]   ;;  %s2178_s9 = inlined_call_operand.vmem [shape: f32[2,1,32], index: 9, kind: input, shape index: {}]   ;;  %s2179_s10 = inlined_call_operand.vmem [shape: f32[2,1,32], index: 10, kind: input, shape index: {}]   ;;  %s2180_s11 = inlined_call_operand.vmem [shape: f32[2,32,64], index: 11, kind: input, shape index: {}]   ;;  %s2181_s12 = inlined_call_operand.vmem [shape: f32[2,1,64], index: 12, kind: input, shape index: {}]   ;;  %s2182_s13 = inlined_call_operand.vmem [shape: f32[2,64,32], index: 13, kind: input, shape index: {}]   ;;  %s2183_s14 = inlined_call_operand.vmem [shape: f32[2,1,32], index: 14, kind: input, shape index: {}]   ;;  %s2184_s15 = inlined_call_operand.vmem [shape: f32[2,1,32], index: 15, kind: input, shape index: {}]   ;;  %s2185_s16 = inlined_call_operand.vmem [shape: f32[2,1,32], index: 16, kind: input, shape index: {}]   ;;  %s2186_s17 = inlined_call_operand.vmem [shape: f32[32,32], index: 17, kind: input, shape index: {}]   ;;  %s2187_s18 = inlined_call_operand.vmem [shape: f32[1,32], index: 18, kind: input, shape index: {}]   ;;  %s2188_s19 = inlined_call_operand.vmem [shape: f32[32,2], index: 19, kind: input, shape index: {}]   ;;  %s2189_s20 = inlined_call_operand.vmem [shape: f32[1,2], index: 20, kind: input, shape index: {}]   ;;  %s2190_s21 = inlined_call_operand.hbm [shape: f32[2,2], index: 21, kind: output, shape index: {}]  }
   0x1   :  { %2198 = sst [smem:[#allocation5_spill]] %s2169_s0 }
   0x2   :  { %2199 = sst [smem:[#allocation6_spill]] %s2170_s1 }
   0x3   :  { %2200 = sst [smem:[#allocation7_spill]] %s2171_s2 }
   0x4   :  { %2201 = sst [smem:[#allocation8_spill]] %s2172_s3 }
   0x5   :  { %2202 = sst [smem:[#allocation9_spill]] %s2173_s4 }
   0x6   :  { %2203 = sst [smem:[#allocation10_spill]] %s2174_s5 }
   0x7   :  { %2204 = sst [smem:[#allocation11_spill]] %s2185_s16 }
   0x8   :  { %s2205_s26 = sld [smem:[#allocation5_spill]]  ;;  %v1603_v3 = vmov 0  }
   0x9   :  { %s2206_s16 = sld [smem:[#allocation6_spill]]  ;;  %1491 = vset.pattern.permute.xlu0 %v1603_v3  ;;  %1492 = vset.pattern.permute.xlu1 %v1603_v3 }
   0xe   :  { %v69_v0 = vld [vmem:[%s2205_s26] sm:$0xff] }
   0xf   :  { %v100_v1 = vld [vmem:[%s2206_s16 + $0x78] sm:$0xff]  ;;  %v99_v2 = vld [vmem:[%s2206_s16 + $0x70] sm:$0xff]  ;;  %74 = vperm.xlu0 %1491, %v69_v0   ;;  %v98_v4 = vld [vmem:[%s2206_s16 + $0x68] sm:$0xff] }
  0x10   :  { %103 = vmatpush.msra.mxu0 %v100_v1  ;;  %v97_v5 = vld [vmem:[%s2206_s16 + $0x60] sm:$0xff]  ;;  %v96_v6 = vld [vmem:[%s2206_s16 + $0x58] sm:$0xff]  ;;  %v95_v7 = vld [vmem:[%s2206_s16 + $0x50] sm:$0xff] }
  0x11   :  { %v94_v8 = vld [vmem:[%s2206_s16 + $0x48] sm:$0xff]  ;;  %v93_v9 = vld [vmem:[%s2206_s16 + $0x40] sm:$0xff] }
  0x12   :  { %104 = vmatpush.msra.mxu0 %v99_v2 }
  0x14   :  { %105 = vmatpush.msra.mxu0 %v98_v4 }
  0x16   :  { %106 = vmatpush.msra.mxu0 %v97_v5 }
  0x18   :  { %107 = vmatpush.msra.mxu0 %v96_v6 }
  0x1a   :  { %108 = vmatpush.msra.mxu0 %v95_v7 }
  0x1b   :  { %26 = vsyncpa [#allocation3], 0  ;;  %v92_v10 = vld [vmem:[%s2206_s16 + $0x38] sm:$0xff]  ;;  %v91_v11 = vld [vmem:[%s2206_s16 + $0x30] sm:$0xff]  ;;  %v71_v18 = vlaneseq  ;;  %v1604_v21 = vmov 1.0   ;;  %s2207_s30 = sld [smem:[#allocation7_spill]] }
  0x1c   :  { %109 = vmatpush.msra.mxu0 %v94_v8  ;;  %v90_v12 = vld [vmem:[%s2206_s16 + $0x28] sm:$0xff]  ;;  %v89_v13 = vld [vmem:[%s2206_s16 + $0x20] sm:$0xff]  ;;  %v88_v14 = vld [vmem:[%s2206_s16 + $0x18] sm:$0xff]  ;;  %vm128_vm1 = vcmask 261120   ;;  %v1605_v26 = vmov 32.0   ;;  %s2208_s1 = sld [smem:[#allocation10_spill]] }
  0x1d   :  { %v87_v15 = vld [vmem:[%s2206_s16 + $0x10] sm:$0xff]  ;;  %v86_v16 = vld [vmem:[%s2206_s16 + $0x8] sm:$0xff]  ;;  %v85_v17 = vld [vmem:[%s2206_s16] sm:$0xff]  ;;  %v72_v19 = vand.u32 127, %v71_v18  ;;  %1513 = vrcp.f32 %v1605_v26  ;;  %s2209_s0 = sld [smem:[#allocation8_spill]]  ;;  %s1606_s24 = smov 96  }
  0x1e   :  { %110 = vmatpush.msra.mxu0 %v93_v9  ;;  %v70_v38 = vld [vmem:[%s2205_s26 + $0x8] sm:$0xff]  ;;  %s2210_s5 = sld [smem:[#allocation9_spill]]  ;;  %v1495_v59 = vld [vmem:[%s2175_s6] ss:$0 sm:$0xff]  ;;  %vm230_vm7 = vcmask 130048   ;;  %vm256_vm8 = vcmask 64512  }
  0x1f   :  { %s1608_s27 = smov 64   ;;  %s1609_s3 = smov 80  }
  0x20   :  { %111 = vmatpush.msra.mxu0 %v92_v10  ;;  %s1610_s28 = smov 48   ;;  %s2196_s26 = smov 16  }
  0x21   :  { %v101_v22 = vld [vmem:[%s2207_s30] sm:$0xff]  ;;  %v102_v62 = vld [vmem:[%s2207_s30 + $0x8] sm:$0xff]  ;;  %s1607_s30 = smov 112   ;;  %s2211_s22 = sld [smem:[#allocation11_spill]] }
  0x22   :  { %112 = vmatpush.msra.mxu0 %v91_v11  ;;  %v193_v39 = vld [vmem:[%s2208_s1 + $0x18] sm:$0xff]  ;;  %v192_v40 = vld [vmem:[%s2208_s1 + $0x10] sm:$0xff]  ;;  %v191_v41 = vld [vmem:[%s2208_s1 + $0x8] sm:$0xff] }
  0x23   :  { %v1514_v27 = vpop.eup %1513  ;;  %216 = vmatpush.msra.mxu1 %v193_v39  ;;  %v190_v42 = vld [vmem:[%s2208_s1] sm:$0xff] }
  0x24   :  { %113 = vmatpush.msra.mxu0 %v90_v12  ;;  %v136_v28 = vmul.f32 32.0, %v1514_v27  ;;  %vm140_vm2 = vweird.f32 %v1514_v27  ;;  %v1493_v52 = vld [vmem:[%s2209_s0] ss:$0 sm:$0xff] }
  0x25   :  { %217 = vmatpush.msra.mxu1 %v192_v40  ;;  %v1494_v55 = vld [vmem:[%s2210_s5] ss:$0 sm:$0xff] }
  0x26   :  { %114 = vmatpush.msra.mxu0 %v89_v13  ;;  %v137_v29 = vsub.f32 1.0, %v136_v28 }
  0x27   :  { %218 = vmatpush.msra.mxu1 %v191_v41 }
  0x28   :  { %115 = vmatpush.msra.mxu0 %v88_v14  ;;  %v138_v30 = vmul.f32 %v1514_v27, %v137_v29 }
  0x29   :  { %219 = vmatpush.msra.mxu1 %v190_v42 }
  0x2a   :  { %116 = vmatpush.msra.mxu0 %v87_v15  ;;  %v139_v31 = vadd.f32 %v1514_v27, %v138_v30 }
  0x2c   :  { %117 = vmatpush.msra.mxu0 %v86_v16  ;;  %v1778_v32 = vsel %vm140_vm2, %v1514_v27, %v139_v31 }
  0x2e   :  { %118 = vmatpush.msra.mxu0 %v85_v17 }
  0x81   :  { %v75_v20 = vpop.permute.xlu0 %74 }
  0x82   :  { %vm79_vm0 = vcmp.eq.s32.totalorder %v72_v19, %v75_v20 }
  0x83   :  { %1409 = vmatmul.msk.f32.vlgmr.msra.gmra.mxu0 %vm79_vm0, %v1604_v21 }
 0x100   :  { %v120_v23 = vpop.f32.mrf.mxu0 }
 0x101   :  { %v121_v24 = vadd.f32 %v120_v23, %v101_v22 }
 0x103   :  { %v129_v25 = vsel %vm128_vm1, %v121_v24, 0.0 }
 0x104   :  { %130 = vadd.xlane.f32.xlu0 %v129_v25 }
 0x177   :  { %v131_v33 = vpop.xlane.xlu0 %130 }
 0x178   :  { %v142_v34 = vmul.f32 %v1778_v32, %v131_v33 }
 0x17a   :  { %v144_v35 = vsub.f32 %v121_v24, %v142_v34 }
 0x17c   :  { %v146_v36 = vmul.f32 %v144_v35, %v144_v35 }
 0x17e   :  { %v148_v37 = vsel %vm128_vm1, %v146_v36, 0.0 }
 0x17f   :  { %149 = vadd.xlane.f32.xlu1 %v148_v37 }
 0x198   :  { %77 = vperm.xlu1 %1492, %v70_v38  }
 0x1f2   :  { %v150_v43 = vpop.xlane.xlu1 %149 }
 0x1f3   :  { %v154_v44 = vmul.f32 %v150_v43, %v1778_v32 }
 0x1f5   :  { %v156_v45 = vadd.f32 1e-12, %v154_v44 }
 0x1f7   :  { %1515 = vrsqrt.f32 %v156_v45  ;;  %vm164_vm4 = vweird.f32 %v156_v45 }
 0x1fd   :  { %v1516_v46 = vpop.eup %1515 }
 0x1fe   :  { %v159_v47 = vmul.f32 %v1516_v46, %v156_v45  ;;  %vm165_vm3 = vweird.f32 %v1516_v46 }
 0x1ff   :  { %vm166_vm5 = vmor %vm164_vm4, %vm165_vm3  ;;  %vm663_vm3 = vcmask 523264  }
 0x200   :  { %v160_v48 = vmul.f32 %v1516_v46, %v159_v47 }
 0x202   :  { %v161_v49 = vmul.f32 0.5, %v160_v48 }
 0x204   :  { %v162_v50 = vsub.f32 1.5, %v161_v49 }
 0x206   :  { %v163_v51 = vmul.f32 %v1516_v46, %v162_v50 }
 0x208   :  { %v167_v53 = vsel %vm166_vm5, %v1516_v46, %v163_v51 }
 0x209   :  { %v178_v54 = vmul.f32 %v167_v53, %v144_v35 }
 0x20a   :  { %v78_v56 = vpop.permute.xlu1 %77 }
 0x20b   :  { %v183_v57 = vmul.f32 %v1493_v52, %v178_v54  ;;  %vm80_vm6 = vcmp.eq.s32.totalorder %v72_v19, %v78_v56 }
 0x20c   :  { %1410 = vmatmul.msk.f32.gmra.mxu0 %vm80_vm6, %v1604_v21 }
 0x20d   :  { %v1804_v58 = vadd.f32 %v1494_v55, %v183_v57 }
 0x20f   :  { %1411 = vmatmul.msk.f32.vlgmr.msra.gmra.mxu1 %vm128_vm1, %v1804_v58 }
 0x289   :  { %v123_v63 = vpop.f32.mrf.mxu0 }
 0x28a   :  { %v124_v0 = vadd.f32 %v123_v63, %v102_v62 }
 0x28c   :  { %v221_v60 = vpop.f32.mrf.mxu1  ;;  %v132_v1 = vsel %vm128_vm1, %v124_v0, 0.0 }
 0x28d   :  { %v1811_v61 = vadd.f32 %v1495_v59, %v221_v60 }
 0x28f   :  { %228 = vrot.lane.b32.xlu2 %v1811_v61, %s1606_s24 }
 0x2b8   :  { %133 = vadd.xlane.f32.xlu2 %v132_v1 }
 0x2e9   :  { %v229_v2 = vpop.permute.xlu2 %228 }
 0x2ea   :  { %1413 = vmatpush.xpose.msk.msra.mxu2 %vm230_vm7, %v229_v2 }
 0x2ed   :  { %1414 = vmatmul.msk.f32.vlgmr.msra.gmra.mxu2 %vm230_vm7, %v1811_v61 }
 0x32b   :  { %v134_v3 = vpop.xlane.xlu2 %133 }
 0x32c   :  { %v143_v4 = vmul.f32 %v1778_v32, %v134_v3 }
 0x32e   :  { %v145_v5 = vsub.f32 %v124_v0, %v143_v4 }
 0x330   :  { %v147_v6 = vmul.f32 %v145_v5, %v145_v5 }
 0x332   :  { %v151_v7 = vsel %vm128_vm1, %v147_v6, 0.0 }
 0x333   :  { %152 = vadd.xlane.f32.xlu1 %v151_v7 }
 0x34c   :  { %294 = vrot.lane.b32.xlu1 %v1811_v61, %s1607_s30 }
 0x370   :  { %v252_v8 = vpop.f32.mrf.mxu2 }
 0x371   :  { %v255_v9 = vmul.f32 0.25, %v252_v8 }
 0x373   :  { %v257_v10 = vsel %vm256_vm8, %v255_v9, -inf }
 0x374   :  { %258 = vmax.xlane.f32.xlu2 %v257_v10 }
 0x38c   :  { %268 = vrot.lane.b32.xlu2 %v1811_v61, %s1608_s27 }
 0x3a6   :  { %v153_v11 = vpop.xlane.xlu1 %152 }
 0x3a7   :  { %v155_v12 = vmul.f32 %v153_v11, %v1778_v32 }
 0x3a9   :  { %v157_v13 = vadd.f32 1e-12, %v155_v12 }
 0x3ab   :  { %1517 = vrsqrt.f32 %v157_v13  ;;  %vm174_vm10 = vweird.f32 %v157_v13 }
 0x3b1   :  { %v1518_v14 = vpop.eup %1517 }
 0x3b2   :  { %v169_v15 = vmul.f32 %v1518_v14, %v157_v13  ;;  %vm175_vm9 = vweird.f32 %v1518_v14 }
 0x3b3   :  { %vm176_vm11 = vmor %vm174_vm10, %vm175_vm9 }
 0x3b4   :  { %v170_v16 = vmul.f32 %v1518_v14, %v169_v15 }
 0x3b6   :  { %v171_v17 = vmul.f32 0.5, %v170_v16  ;;  %v504_v16 = vld [vmem:[%s2176_s7 + $0x18] sm:$0xff] }
 0x3b8   :  { %v172_v18 = vsub.f32 1.5, %v171_v17  ;;  %v503_v17 = vld [vmem:[%s2176_s7 + $0x10] sm:$0xff] }
 0x3ba   :  { %v173_v19 = vmul.f32 %v1518_v14, %v172_v18  ;;  %v502_v18 = vld [vmem:[%s2176_s7 + $0x8] sm:$0xff] }
 0x3bc   :  { %v177_v20 = vsel %vm176_vm11, %v1518_v14, %v173_v19 }
 0x3bd   :  { %v179_v21 = vmul.f32 %v177_v20, %v145_v5  ;;  %v501_v20 = vld [vmem:[%s2176_s7] sm:$0xff] }
 0x3be   :  { %v295_v37 = vpop.permute.xlu1 %294 }
 0x3bf   :  { %v184_v22 = vmul.f32 %v1493_v52, %v179_v21 }
 0x3c1   :  { %v1830_v23 = vadd.f32 %v1494_v55, %v184_v22 }
 0x3c3   :  { %1412 = vmatmul.msk.f32.gmra.mxu1 %vm128_vm1, %v1830_v23 }
 0x3e7   :  { %v259_v24 = vpop.xlane.xlu2 %258 }
 0x3e8   :  { %v260_v25 = vsub.f32 %v255_v9, %v259_v24 }
 0x3ea   :  { %v261_v26 = vmul.f32 1.442695, %v260_v25 }
 0x3ec   :  { %1519 = vpow2.f32 %v261_v26 }
 0x3ef   :  { %v269_v27 = vpop.permute.xlu2 %268 }
 0x3f0   :  { %289 = vmatpush.msra.mxu3 %v269_v27  ;;  %v1496_v27 = vld [vmem:[%s2177_s8] ss:$0 sm:$0xff] }
 0x3f2   :  { %v1520_v28 = vpop.eup %1519 }
 0x3f3   :  { %v263_v29 = vsel %vm256_vm8, %v1520_v28, 0.0 }
 0x3f4   :  { %264 = vadd.xlane.f32.xlu0 %v263_v29 }
 0x408   :  { %296 = vrot.lane.b32.xlu0 %v1811_v61, %s1609_s3 }
 0x440   :  { %v224_v30 = vpop.f32.mrf.mxu1 }
 0x441   :  { %v225_v31 = vadd.f32 %v1495_v59, %v224_v30 }
 0x443   :  { %430 = vrot.lane.b32.xlu2 %v225_v31, %s1607_s30  ;;  %432 = vrot.lane.b32.xlu0 %v225_v31, %s1609_s3 }
 0x44b   :  { %366 = vrot.lane.b32.xlu0 %v225_v31, %s1606_s24 }
 0x467   :  { %v265_v33 = vpop.xlane.xlu0 %264 }
 0x468   :  { %1521 = vrcp.f32 %v265_v33 }
 0x46e   :  { %v1522_v34 = vpop.eup %1521 }
 0x46f   :  { %v267_v35 = vmul.f32 %v1522_v34, %v1520_v28 }
 0x471   :  { %1415 = vmatmul.msk.f32.vlgmr.msra.gmra.mxu3 %vm256_vm8, %v267_v35 }
 0x47a   :  { %v297_v36 = vpop.permute.xlu0 %296 }
 0x47b   :  { %1416 = vmatpush.xpose.msk.msrb.mxu3 %vm230_vm7, %v297_v36 }
 0x47e   :  { %1417 = vmatmul.msk.f32.vlgmr.msrb.gmra.mxu3 %vm230_vm7, %v295_v37 }
 0x49d   :  { %v431_v39 = vpop.permute.xlu2 %430 }
 0x4b5   :  { %v433_v38 = vpop.permute.xlu0 %432 }
 0x4b6   :  { %1422 = vmatpush.xpose.msk.msrb.mxu1 %vm230_vm7, %v433_v38 }
 0x4b9   :  { %1423 = vmatmul.msk.f32.vlgmr.msrb.gmra.mxu1 %vm230_vm7, %v431_v39 }
 0x4bd   :  { %v367_v40 = vpop.permute.xlu0 %366 }
 0x4be   :  { %1419 = vmatpush.xpose.msk.msra.mxu3 %vm230_vm7, %v367_v40 }
 0x4c1   :  { %1420 = vmatmul.msk.f32.vlgmr.msra.gmra.mxu3 %vm230_vm7, %v225_v31 }
 0x4f4   :  { %v1847_v41 = vpop.f32.mrf.mxu3 }
 0x501   :  { %v319_v42 = vpop.f32.mrf.mxu3 }
 0x502   :  { %v322_v43 = vmul.f32 0.25, %v319_v42 }
 0x504   :  { %v323_v44 = vsel %vm256_vm8, %v322_v43, -inf }
 0x505   :  { %324 = vmax.xlane.f32.xlu2 %v323_v44 }
 0x51d   :  { %334 = vrot.lane.b32.xlu2 %v1811_v61, %s1610_s28 }
 0x525   :  { %404 = vrot.lane.b32.xlu2 %v225_v31, %s1608_s27 }
 0x536   :  { %v455_v45 = vpop.f32.mrf.mxu1 }
 0x537   :  { %v458_v46 = vmul.f32 0.25, %v455_v45 }
 0x539   :  { %v459_v47 = vsel %vm256_vm8, %v458_v46, -inf }
 0x53a   :  { %460 = vmax.xlane.f32.xlu0 %v459_v47  ;;  %v597_v47 = vld [vmem:[%s2180_s11 + $0x8] sm:$0xff] }
 0x544   :  { %v389_v48 = vpop.f32.mrf.mxu3 }
 0x545   :  { %v392_v49 = vmul.f32 0.25, %v389_v48  ;;  %v596_v48 = vld [vmem:[%s2180_s11] sm:$0xff] }
 0x547   :  { %v393_v50 = vsel %vm256_vm8, %v392_v49, -inf }
 0x548   :  { %394 = vmax.xlane.f32.xlu0 %v393_v50 }
 0x55c   :  { %470 = vrot.lane.b32.xlu0 %v225_v31, %s1610_s28 }
 0x578   :  { %v325_v51 = vpop.xlane.xlu2 %324 }
 0x579   :  { %v326_v52 = vsub.f32 %v322_v43, %v325_v51 }
 0x57b   :  { %v327_v53 = vmul.f32 1.442695, %v326_v52 }
 0x57d   :  { %1523 = vpow2.f32 %v327_v53 }
 0x580   :  { %v335_v54 = vpop.permute.xlu2 %334 }
 0x581   :  { %355 = vmatpush.msrb.mxu2 %v335_v54 }
 0x583   :  { %v1524_v55 = vpop.eup %1523 }
 0x584   :  { %v329_v56 = vsel %vm256_vm8, %v1524_v55, 0.0 }
 0x585   :  { %330 = vadd.xlane.f32.xlu1 %v329_v56 }
 0x588   :  { %v405_v57 = vpop.permute.xlu2 %404 }
 0x589   :  { %425 = vmatpush.msra.mxu2 %v405_v57 }
 0x5ad   :  { %v461_v59 = vpop.xlane.xlu0 %460 }
 0x5ae   :  { %v462_v60 = vsub.f32 %v458_v46, %v461_v59  ;;  %v598_v46 = vld [vmem:[%s2180_s11 + $0x10] sm:$0xff]  ;;  %v1497_v59 = vld [vmem:[%s2178_s9] ss:$0 sm:$0xff] }
 0x5b0   :  { %v463_v61 = vmul.f32 1.442695, %v462_v60 }
 0x5b2   :  { %1525 = vpow2.f32 %v463_v61 }
 0x5b8   :  { %v1526_v62 = vpop.eup %1525 }
 0x5b9   :  { %v465_v63 = vsel %vm256_vm8, %v1526_v62, 0.0 }
 0x5ba   :  { %466 = vadd.xlane.f32.xlu1 %v465_v63 }
 0x5bb   :  { %v395_v0 = vpop.xlane.xlu0 %394 }
 0x5bc   :  { %v396_v1 = vsub.f32 %v392_v49, %v395_v0 }
 0x5be   :  { %v397_v2 = vmul.f32 1.442695, %v396_v1 }
 0x5c0   :  { %1527 = vpow2.f32 %v397_v2 }
 0x5c6   :  { %v1528_v3 = vpop.eup %1527 }
 0x5c7   :  { %v399_v4 = vsel %vm256_vm8, %v1528_v3, 0.0 }
 0x5c8   :  { %400 = vadd.xlane.f32.xlu1 %v399_v4 }
 0x5ce   :  { %v471_v5 = vpop.permute.xlu0 %470 }
 0x5cf   :  { %491 = vmatpush.msrb.mxu3 %v471_v5 }
 0x5f8   :  { %v331_v6 = vpop.xlane.xlu1 %330 }
 0x5f9   :  { %1529 = vrcp.f32 %v331_v6 }
 0x5ff   :  { %v1530_v7 = vpop.eup %1529 }
 0x600   :  { %v333_v8 = vmul.f32 %v1530_v7, %v1524_v55 }
 0x602   :  { %1418 = vmatmul.msk.f32.vlgmr.msrb.gmra.mxu2 %vm256_vm8, %v333_v8 }
 0x603   :  { %527 = vmatpush.msrb.mxu2 %v504_v16  ;;  %v656_v16 = vld [vmem:[%s2182_s13 + $0x28] sm:$0xff] }
 0x605   :  { %528 = vmatpush.msrb.mxu2 %v503_v17  ;;  %v655_v17 = vld [vmem:[%s2182_s13 + $0x20] sm:$0xff] }
 0x607   :  { %529 = vmatpush.msrb.mxu2 %v502_v18  ;;  %v654_v18 = vld [vmem:[%s2182_s13 + $0x18] sm:$0xff] }
 0x609   :  { %530 = vmatpush.msrb.mxu2 %v501_v20  ;;  %v652_v20 = vld [vmem:[%s2182_s13 + $0x8] sm:$0xff] }
 0x62d   :  { %v467_v9 = vpop.xlane.xlu1 %466 }
 0x62e   :  { %1531 = vrcp.f32 %v467_v9 }
 0x634   :  { %v1532_v10 = vpop.eup %1531 }
 0x635   :  { %v469_v11 = vmul.f32 %v1532_v10, %v1526_v62  ;;  %v1498_v62 = vld [vmem:[%s2179_s10] ss:$0 sm:$0xff] }
 0x637   :  { %1424 = vmatmul.msk.f32.vlgmr.msrb.gmra.mxu3 %vm256_vm8, %v469_v11 }
 0x63b   :  { %v401_v12 = vpop.xlane.xlu1 %400 }
 0x63c   :  { %1533 = vrcp.f32 %v401_v12 }
 0x642   :  { %v1534_v13 = vpop.eup %1533 }
 0x643   :  { %v403_v14 = vmul.f32 %v1534_v13, %v1528_v3 }
 0x645   :  { %1421 = vmatmul.msk.f32.vlgmr.msra.gmra.mxu2 %vm256_vm8, %v403_v14  ;;  %v658_v14 = vld [vmem:[%s2182_s13 + $0x38] sm:$0xff] }
 0x646   :  { %678 = vmatpush.msra.mxu3 %v658_v14  ;;  %v1501_v14 = vld [vmem:[%s2184_s15] ss:$0 sm:$0xff] }
 0x685   :  { %v357_v15 = vpop.f32.mrf.mxu2 }
 0x686   :  { %361 = vrot.lane.b32.xlu1 %v357_v15, %s2196_s26  ;;  %v657_v15 = vld [vmem:[%s2182_s13 + $0x30] sm:$0xff] }
 0x687   :  { %679 = vmatpush.msra.mxu3 %v657_v15 }
 0x689   :  { %680 = vmatpush.msra.mxu3 %v656_v16 }
 0x68b   :  { %681 = vmatpush.msra.mxu3 %v655_v17  ;;  %v1502_v17 = vld [vmem:[%s2211_s22] ss:$0 sm:$0xff] }
 0x68d   :  { %682 = vmatpush.msra.mxu3 %v654_v18 }
 0x6ba   :  { %v493_v19 = vpop.f32.mrf.mxu3 }
 0x6bb   :  { %497 = vrot.lane.b32.xlu2 %v493_v19, %s2196_s26  ;;  %v653_v19 = vld [vmem:[%s2182_s13 + $0x10] sm:$0xff] }
 0x6bc   :  { %683 = vmatpush.msra.mxu3 %v653_v19 }
 0x6be   :  { %684 = vmatpush.msra.mxu3 %v652_v20 }
 0x6c8   :  { %v427_v24 = vpop.f32.mrf.mxu2 }
 0x6f8   :  { %v362_v21 = vpop.permute.xlu1 %361 }
 0x6f9   :  { %v364_v22 = vsel %vm230_vm7, %v1847_v41, %v362_v21  ;;  %v651_v21 = vld [vmem:[%s2182_s13] sm:$0xff] }
 0x6fa   :  { %1425 = vmatmul.msk.f32.vlgmr.msrb.gmra.mxu2 %vm128_vm1, %v364_v22  ;;  %685 = vmatpush.msra.mxu3 %v651_v21  ;;  %v1499_v22 = vld [vmem:[%s2181_s12] ss:$0 sm:$0xff] }
 0x715   :  { %v498_v25 = vpop.permute.xlu2 %497 }
 0x716   :  { %v500_v26 = vsel %vm230_vm7, %v427_v24, %v498_v25 }
 0x717   :  { %1426 = vmatmul.msk.f32.gmra.mxu2 %vm128_vm1, %v500_v26 }
 0x77d   :  { %v532_v28 = vpop.f32.mrf.mxu2 }
 0x77e   :  { %v533_v29 = vadd.f32 %v1496_v27, %v532_v28 }
 0x780   :  { %v538_v30 = vadd.f32 %v533_v29, %v1804_v58 }
 0x782   :  { %v542_v31 = vsel %vm128_vm1, %v538_v30, 0.0 }
 0x783   :  { %543 = vadd.xlane.f32.xlu0 %v542_v31 }
 0x79a   :  { %v535_v33 = vpop.f32.mrf.mxu2 }
 0x79b   :  { %v536_v34 = vadd.f32 %v1496_v27, %v535_v33 }
 0x79d   :  { %v539_v35 = vadd.f32 %v536_v34, %v1830_v23  ;;  %v599_v23 = vld [vmem:[%s2180_s11 + $0x18] sm:$0xff] }
 0x79e   :  { %622 = vmatpush.msra.mxu1 %v599_v23  ;;  %v1500_v23 = vld [vmem:[%s2183_s14] ss:$0 sm:$0xff] }
 0x79f   :  { %v545_v36 = vsel %vm128_vm1, %v539_v35, 0.0 }
 0x7a0   :  { %546 = vadd.xlane.f32.xlu2 %v545_v36  ;;  %623 = vmatpush.msra.mxu1 %v598_v46 }
 0x7a2   :  { %624 = vmatpush.msra.mxu1 %v597_v47 }
 0x7a4   :  { %625 = vmatpush.msra.mxu1 %v596_v48 }
 0x7f6   :  { %v544_v37 = vpop.xlane.xlu0 %543 }
 0x7f7   :  { %v548_v38 = vmul.f32 %v544_v37, %v1778_v32 }
 0x7f9   :  { %v550_v39 = vsub.f32 %v538_v30, %v548_v38 }
 0x7fb   :  { %v552_v40 = vmul.f32 %v550_v39, %v550_v39 }
 0x7fd   :  { %v554_v41 = vsel %vm128_vm1, %v552_v40, 0.0 }
 0x7fe   :  { %555 = vadd.xlane.f32.xlu1 %v554_v41 }
 0x813   :  { %v547_v42 = vpop.xlane.xlu2 %546 }
 0x814   :  { %v549_v58 = vmul.f32 %v547_v42, %v1778_v32 }
 0x816   :  { %v551_v43 = vsub.f32 %v539_v35, %v549_v58 }
 0x818   :  { %v553_v44 = vmul.f32 %v551_v43, %v551_v43 }
 0x81a   :  { %v557_v45 = vsel %vm128_vm1, %v553_v44, 0.0 }
 0x81b   :  { %558 = vadd.xlane.f32.xlu0 %v557_v45 }
 0x871   :  { %v556_v49 = vpop.xlane.xlu1 %555 }
 0x872   :  { %v560_v50 = vmul.f32 %v556_v49, %v1778_v32 }
 0x874   :  { %v562_v51 = vadd.f32 1e-12, %v560_v50 }
 0x876   :  { %1535 = vrsqrt.f32 %v562_v51  ;;  %vm570_vm13 = vweird.f32 %v562_v51 }
 0x87c   :  { %v1536_v52 = vpop.eup %1535 }
 0x87d   :  { %v565_v53 = vmul.f32 %v1536_v52, %v562_v51  ;;  %vm571_vm12 = vweird.f32 %v1536_v52 }
 0x87e   :  { %vm572_vm14 = vmor %vm570_vm13, %vm571_vm12 }
 0x87f   :  { %v566_v54 = vmul.f32 %v1536_v52, %v565_v53 }
 0x881   :  { %v567_v55 = vmul.f32 0.5, %v566_v54 }
 0x883   :  { %v568_v56 = vsub.f32 1.5, %v567_v55 }
 0x885   :  { %v569_v57 = vmul.f32 %v1536_v52, %v568_v56 }
 0x887   :  { %v573_v60 = vsel %vm572_vm14, %v1536_v52, %v569_v57 }
 0x888   :  { %v584_v61 = vmul.f32 %v573_v60, %v550_v39 }
 0x88a   :  { %v589_v63 = vmul.f32 %v1497_v59, %v584_v61 }
 0x88c   :  { %v1911_v0 = vadd.f32 %v1498_v62, %v589_v63 }
 0x88e   :  { %1427 = vmatmul.msk.f32.vlgmr.msra.gmra.mxu1 %vm128_vm1, %v1911_v0  ;;  %v559_v1 = vpop.xlane.xlu0 %558 }
 0x88f   :  { %v561_v2 = vmul.f32 %v559_v1, %v1778_v32  ;;  %v1434_v1 = vld [vmem:[%s2208_s1 + $0x38] sm:$0xff] }
 0x890   :  { %779 = vmatpush.msra.mxu2 %v1434_v1 }
 0x891   :  { %v563_v3 = vadd.f32 1e-12, %v561_v2  ;;  %v1433_v2 = vld [vmem:[%s2208_s1 + $0x30] sm:$0xff] }
 0x892   :  { %780 = vmatpush.msra.mxu2 %v1433_v2 }
 0x893   :  { %1537 = vrsqrt.f32 %v563_v3  ;;  %vm580_vm0 = vweird.f32 %v563_v3 }
 0x899   :  { %v1538_v4 = vpop.eup %1537 }
 0x89a   :  { %v575_v5 = vmul.f32 %v1538_v4, %v563_v3  ;;  %vm581_vm15 = vweird.f32 %v1538_v4  ;;  %v1432_v3 = vld [vmem:[%s2208_s1 + $0x28] sm:$0xff] }
 0x89b   :  { %vm582_vm2 = vmor %vm580_vm0, %vm581_vm15  ;;  %781 = vmatpush.msra.mxu2 %v1432_v3 }
 0x89c   :  { %v576_v6 = vmul.f32 %v1538_v4, %v575_v5 }
 0x89e   :  { %v577_v7 = vmul.f32 0.5, %v576_v6 }
 0x8a0   :  { %v578_v8 = vsub.f32 1.5, %v577_v7 }
 0x8a2   :  { %v579_v9 = vmul.f32 %v1538_v4, %v578_v8 }
 0x8a4   :  { %v583_v10 = vsel %vm582_vm2, %v1538_v4, %v579_v9  ;;  %v1431_v4 = vld [vmem:[%s2208_s1 + $0x20] sm:$0xff] }
 0x8a5   :  { %v585_v11 = vmul.f32 %v583_v10, %v551_v43  ;;  %782 = vmatpush.msra.mxu2 %v1431_v4 }
 0x8a7   :  { %v590_v12 = vmul.f32 %v1497_v59, %v585_v11 }
 0x8a9   :  { %v595_v13 = vadd.f32 %v1498_v62, %v590_v12 }
 0x8ab   :  { %1428 = vmatmul.msk.f32.gmra.mxu1 %vm128_vm1, %v595_v13 }
 0x90b   :  { %v627_v24 = vpop.f32.mrf.mxu1 }
 0x90c   :  { %v628_v25 = vadd.f32 %v1499_v22, %v627_v24 }
 0x90e   :  { %v635_v26 = vmul.f32 0.044715, %v628_v25  ;;  %v633_v33 = vmul.f32 0.5, %v628_v25 }
 0x910   :  { %v637_v27 = vmul.f32 %v635_v26, %v628_v25 }
 0x912   :  { %v639_v28 = vmul.f32 %v637_v27, %v628_v25 }
 0x914   :  { %v641_v29 = vadd.f32 %v639_v28, %v628_v25 }
 0x916   :  { %v643_v30 = vmul.f32 0.7978846, %v641_v29 }
 0x918   :  { %1539 = vtanh.f32 %v643_v30 }
 0x91e   :  { %v1540_v31 = vpop.eup %1539 }
 0x91f   :  { %v647_v34 = vadd.f32 1.0, %v1540_v31 }
 0x921   :  { %v649_v35 = vmul.f32 %v647_v34, %v633_v33 }
 0x923   :  { %1429 = vmatmul.msk.f32.vlgmr.msra.gmra.mxu3 %vm663_vm3, %v649_v35  ;;  %v1503_v35 = vld [vmem:[%s2175_s6 + $0x1] ss:$0 sm:$0xff] }
 0x928   :  { %v630_v36 = vpop.f32.mrf.mxu1 }
 0x929   :  { %v631_v37 = vadd.f32 %v1499_v22, %v630_v36 }
 0x92b   :  { %v636_v38 = vmul.f32 0.044715, %v631_v37  ;;  %v634_v43 = vmul.f32 0.5, %v631_v37 }
 0x92d   :  { %v638_v39 = vmul.f32 %v636_v38, %v631_v37 }
 0x92f   :  { %v640_v40 = vmul.f32 %v638_v39, %v631_v37 }
 0x931   :  { %v642_v41 = vadd.f32 %v640_v40, %v631_v37 }
 0x933   :  { %v644_v42 = vmul.f32 0.7978846, %v642_v41 }
 0x935   :  { %1541 = vtanh.f32 %v644_v42 }
 0x93b   :  { %v1542_v58 = vpop.eup %1541 }
 0x93c   :  { %v648_v44 = vadd.f32 1.0, %v1542_v58 }
 0x93e   :  { %v650_v45 = vmul.f32 %v648_v44, %v634_v43 }
 0x940   :  { %1430 = vmatmul.msk.f32.gmra.mxu3 %vm663_vm3, %v650_v45 }
 0x9a6   :  { %v687_v46 = vpop.f32.mrf.mxu3 }
 0x9a7   :  { %v688_v47 = vadd.f32 %v1500_v23, %v687_v46 }
 0x9a9   :  { %v693_v48 = vadd.f32 %v688_v47, %v1911_v0 }
 0x9ab   :  { %v697_v49 = vsel %vm128_vm1, %v693_v48, 0.0 }
 0x9ac   :  { %698 = vadd.xlane.f32.xlu2 %v697_v49 }
 0x9c3   :  { %v690_v50 = vpop.f32.mrf.mxu3 }
 0x9c4   :  { %v691_v51 = vadd.f32 %v1500_v23, %v690_v50 }
 0x9c6   :  { %v694_v52 = vadd.f32 %v691_v51, %v595_v13 }
 0x9c8   :  { %v700_v53 = vsel %vm128_vm1, %v694_v52, 0.0 }
 0x9c9   :  { %701 = vadd.xlane.f32.xlu0 %v700_v53 }
 0xa1f   :  { %v699_v54 = vpop.xlane.xlu2 %698 }
 0xa20   :  { %v703_v55 = vmul.f32 %v699_v54, %v1778_v32 }
 0xa22   :  { %v705_v56 = vsub.f32 %v693_v48, %v703_v55 }
 0xa24   :  { %v707_v57 = vmul.f32 %v705_v56, %v705_v56 }
 0xa26   :  { %v709_v59 = vsel %vm128_vm1, %v707_v57, 0.0 }
 0xa27   :  { %710 = vadd.xlane.f32.xlu2 %v709_v59 }
 0xa3c   :  { %v702_v60 = vpop.xlane.xlu0 %701 }
 0xa3d   :  { %v704_v61 = vmul.f32 %v702_v60, %v1778_v32 }
 0xa3f   :  { %v706_v62 = vsub.f32 %v694_v52, %v704_v61 }
 0xa41   :  { %v708_v63 = vmul.f32 %v706_v62, %v706_v62 }
 0xa43   :  { %v712_v0 = vsel %vm128_vm1, %v708_v63, 0.0 }
 0xa44   :  { %713 = vadd.xlane.f32.xlu0 %v712_v0 }
 0xa9a   :  { %v711_v5 = vpop.xlane.xlu2 %710 }
 0xa9b   :  { %v715_v6 = vmul.f32 %v711_v5, %v1778_v32 }
 0xa9d   :  { %v717_v7 = vadd.f32 1e-12, %v715_v6 }
 0xa9f   :  { %1543 = vrsqrt.f32 %v717_v7  ;;  %vm725_vm5 = vweird.f32 %v717_v7 }
 0xaa5   :  { %v1544_v8 = vpop.eup %1543 }
 0xaa6   :  { %v720_v9 = vmul.f32 %v1544_v8, %v717_v7  ;;  %vm726_vm4 = vweird.f32 %v1544_v8 }
 0xaa7   :  { %vm727_vm6 = vmor %vm725_vm5, %vm726_vm4 }
 0xaa8   :  { %v721_v10 = vmul.f32 %v1544_v8, %v720_v9 }
 0xaaa   :  { %v722_v11 = vmul.f32 0.5, %v721_v10 }
 0xaac   :  { %v723_v12 = vsub.f32 1.5, %v722_v11 }
 0xaae   :  { %v724_v13 = vmul.f32 %v1544_v8, %v723_v12 }
 0xab0   :  { %v728_v15 = vsel %vm727_vm6, %v1544_v8, %v724_v13 }
 0xab1   :  { %v739_v16 = vmul.f32 %v728_v15, %v705_v56 }
 0xab3   :  { %v744_v18 = vmul.f32 %v1501_v14, %v739_v16 }
 0xab5   :  { %v1975_v19 = vadd.f32 %v1502_v17, %v744_v18 }
 0xab7   :  { %v714_v20 = vpop.xlane.xlu0 %713  ;;  %1436 = vmatmul.msk.f32.vlgmr.msra.gmra.mxu2 %vm128_vm1, %v1975_v19 }
 0xab8   :  { %v716_v21 = vmul.f32 %v714_v20, %v1778_v32 }
 0xaba   :  { %v718_v22 = vadd.f32 1e-12, %v716_v21 }
 0xabc   :  { %1545 = vrsqrt.f32 %v718_v22  ;;  %vm735_vm10 = vweird.f32 %v718_v22 }
 0xac2   :  { %v1546_v24 = vpop.eup %1545 }
 0xac3   :  { %v730_v25 = vmul.f32 %v1546_v24, %v718_v22  ;;  %vm736_vm9 = vweird.f32 %v1546_v24 }
 0xac4   :  { %vm737_vm11 = vmor %vm735_vm10, %vm736_vm9  ;;  %vm1324_vm9 = vcmask 1040384   ;;  %vm1389_vm10 = vcmask 9216  }
 0xac5   :  { %v731_v26 = vmul.f32 %v1546_v24, %v730_v25 }
 0xac7   :  { %v732_v27 = vmul.f32 0.5, %v731_v26 }
 0xac9   :  { %v733_v28 = vsub.f32 1.5, %v732_v27 }
 0xacb   :  { %v734_v29 = vmul.f32 %v1546_v24, %v733_v28 }
 0xacd   :  { %v738_v30 = vsel %vm737_vm11, %v1546_v24, %v734_v29 }
 0xace   :  { %v740_v31 = vmul.f32 %v738_v30, %v706_v62 }
 0xad0   :  { %v745_v33 = vmul.f32 %v1501_v14, %v740_v31 }
 0xad2   :  { %v1980_v34 = vadd.f32 %v1502_v17, %v745_v33  ;;  %v1453_v33 = vld [vmem:[%s2176_s7 + $0x38] sm:$0xff] }
 0xad4   :  { %1437 = vmatmul.msk.f32.gmra.mxu2 %vm128_vm1, %v1980_v34 }
 0xb3a   :  { %v784_v36 = vpop.f32.mrf.mxu2 }
 0xb3b   :  { %v1987_v37 = vadd.f32 %v1503_v35, %v784_v36 }
 0xb3d   :  { %855 = vrot.lane.b32.xlu0 %v1987_v37, %s1607_s30  ;;  %857 = vrot.lane.b32.xlu2 %v1987_v37, %s1609_s3 }
 0xb3e   :  { %791 = vrot.lane.b32.xlu1 %v1987_v37, %s1606_s24 }
 0xb57   :  { %v787_v38 = vpop.f32.mrf.mxu2 }
 0xb58   :  { %v1995_v39 = vadd.f32 %v1503_v35, %v787_v38  ;;  %v1452_v35 = vld [vmem:[%s2176_s7 + $0x30] sm:$0xff] }
 0xb5a   :  { %993 = vrot.lane.b32.xlu0 %v1995_v39, %s1609_s3  ;;  %927 = vrot.lane.b32.xlu2 %v1995_v39, %s1606_s24  ;;  %s2212_s3 = smov 16   ;;  %s1612_s24 = smov [#allocation2]  }
 0xb5b   :  { %991 = vrot.lane.b32.xlu1 %v1995_v39, %s1607_s30 }
 0xb97   :  { %v858_v40 = vpop.permute.xlu2 %857 }
 0xb98   :  { %1441 = vmatpush.xpose.msk.msrb.mxu0 %vm230_vm7, %v858_v40 }
 0xbaf   :  { %v856_v41 = vpop.permute.xlu0 %855 }
 0xbb0   :  { %v792_v42 = vpop.permute.xlu1 %791  ;;  %1442 = vmatmul.msk.f32.vlgmr.msrb.gmra.mxu0 %vm230_vm7, %v856_v41 }
 0xbb1   :  { %1438 = vmatpush.xpose.msk.msrb.mxu3 %vm230_vm7, %v792_v42 }
 0xbb4   :  { %1439 = vmatmul.msk.f32.vlgmr.msrb.gmra.mxu3 %vm230_vm7, %v1987_v37  ;;  %v928_v58 = vpop.permute.xlu2 %927 }
 0xbb5   :  { %1444 = vmatpush.xpose.msk.msra.mxu3 %vm230_vm7, %v928_v58 }
 0xbb9   :  { %1090 = vmatpush.msrb.mxu3 %v1453_v33  ;;  %v1472_v33 = vld [vmem:[%s2182_s13 + $0x70] sm:$0xff] }
 0xbbb   :  { %1091 = vmatpush.msrb.mxu3 %v1452_v35  ;;  %v1471_v35 = vld [vmem:[%s2182_s13 + $0x68] sm:$0xff] }
 0xbbc   :  { %1445 = vmatmul.msk.f32.vlgmr.msra.gmra.mxu3 %vm230_vm7, %v1995_v39 }
 0xbcc   :  { %v994_v43 = vpop.permute.xlu0 %993 }
 0xbcd   :  { %1447 = vmatpush.xpose.msk.msra.mxu0 %vm230_vm7, %v994_v43  ;;  %v992_v44 = vpop.permute.xlu1 %991 }
 0xbd0   :  { %1448 = vmatmul.msk.f32.vlgmr.msra.gmra.mxu0 %vm230_vm7, %v992_v44  ;;  %v1504_v44 = vld [vmem:[%s2177_s8 + $0x1] ss:$0 sm:$0xff] }
 0xc2d   :  { %v880_v45 = vpop.f32.mrf.mxu0 }
 0xc2e   :  { %v883_v23 = vmul.f32 0.25, %v880_v45 }
 0xc30   :  { %v884_v46 = vsel %vm256_vm8, %v883_v23, -inf }
 0xc31   :  { %885 = vmax.xlane.f32.xlu1 %v884_v46 }
 0xc37   :  { %v814_v47 = vpop.f32.mrf.mxu3 }
 0xc38   :  { %v817_v48 = vmul.f32 0.25, %v814_v47 }
 0xc3a   :  { %v818_v49 = vsel %vm256_vm8, %v817_v48, -inf }
 0xc3b   :  { %819 = vmax.xlane.f32.xlu0 %v818_v49 }
 0xc3f   :  { %v950_v50 = vpop.f32.mrf.mxu3 }
 0xc40   :  { %v953_v51 = vmul.f32 0.25, %v950_v50 }
 0xc42   :  { %v954_v52 = vsel %vm256_vm8, %v953_v51, -inf }
 0xc43   :  { %955 = vmax.xlane.f32.xlu0 %v954_v52 }
 0xc4d   :  { %v1016_v53 = vpop.f32.mrf.mxu0 }
 0xc4e   :  { %v1019_v54 = vmul.f32 0.25, %v1016_v53 }
 0xc50   :  { %v1020_v55 = vsel %vm256_vm8, %v1019_v54, -inf }
 0xc51   :  { %1021 = vmax.xlane.f32.xlu2 %v1020_v55 }
 0xc57   :  { %829 = vrot.lane.b32.xlu0 %v1987_v37, %s1608_s27 }
 0xca4   :  { %v886_v56 = vpop.xlane.xlu1 %885 }
 0xca5   :  { %v887_v57 = vsub.f32 %v883_v23, %v886_v56 }
 0xca7   :  { %v888_v59 = vmul.f32 1.442695, %v887_v57 }
 0xca9   :  { %1547 = vpow2.f32 %v888_v59 }
 0xcae   :  { %v820_v60 = vpop.xlane.xlu0 %819 }
 0xcaf   :  { %v1548_v61 = vpop.eup %1547  ;;  %v821_v62 = vsub.f32 %v817_v48, %v820_v60 }
 0xcb0   :  { %v890_v63 = vsel %vm256_vm8, %v1548_v61, 0.0 }
 0xcb1   :  { %v822_v0 = vmul.f32 1.442695, %v821_v62  ;;  %891 = vadd.xlane.f32.xlu2 %v890_v63  ;;  %v1461_v62 = vld [vmem:[%s2180_s11 + $0x30] sm:$0xff]  ;;  %v1460_v63 = vld [vmem:[%s2180_s11 + $0x28] sm:$0xff] }
 0xcb3   :  { %1549 = vpow2.f32 %v822_v0  ;;  %v1459_v0 = vld [vmem:[%s2180_s11 + $0x20] sm:$0xff] }
 0xcb6   :  { %v956_v1 = vpop.xlane.xlu0 %955 }
 0xcb7   :  { %v957_v2 = vsub.f32 %v953_v51, %v956_v1 }
 0xcb9   :  { %v1550_v3 = vpop.eup %1549  ;;  %v958_v4 = vmul.f32 1.442695, %v957_v2 }
 0xcba   :  { %v824_v5 = vsel %vm256_vm8, %v1550_v3, 0.0 }
 0xcbb   :  { %1551 = vpow2.f32 %v958_v4  ;;  %825 = vadd.xlane.f32.xlu1 %v824_v5 }
 0xcc1   :  { %v1552_v6 = vpop.eup %1551 }
 0xcc2   :  { %v960_v7 = vsel %vm256_vm8, %v1552_v6, 0.0 }
 0xcc3   :  { %961 = vadd.xlane.f32.xlu0 %v960_v7 }
 0xcc4   :  { %v1022_v8 = vpop.xlane.xlu2 %1021 }
 0xcc5   :  { %v1023_v9 = vsub.f32 %v1019_v54, %v1022_v8 }
 0xcc7   :  { %v1024_v10 = vmul.f32 1.442695, %v1023_v9 }
 0xcc9   :  { %1553 = vpow2.f32 %v1024_v10  ;;  %v830_v11 = vpop.permute.xlu0 %829  ;;  %895 = vrot.lane.b32.xlu2 %v1987_v37, %s1610_s28  ;;  %v1451_v37 = vld [vmem:[%s2176_s7 + $0x28] sm:$0xff]  ;;  %v1505_v10 = vld [vmem:[%s2178_s9 + $0x1] ss:$0 sm:$0xff] }
 0xcca   :  { %850 = vmatpush.msrb.mxu1 %v830_v11  ;;  %1092 = vmatpush.msrb.mxu3 %v1451_v37  ;;  %v1469_v37 = vld [vmem:[%s2182_s13 + $0x58] sm:$0xff] }
 0xccf   :  { %v1554_v12 = vpop.eup %1553 }
 0xcd0   :  { %v1026_v13 = vsel %vm256_vm8, %v1554_v12, 0.0 }
 0xcd1   :  { %1027 = vadd.xlane.f32.xlu1 %v1026_v13  ;;  %965 = vrot.lane.b32.xlu2 %v1995_v39, %s1608_s27  ;;  %v1506_v13 = vld [vmem:[%s2179_s10 + $0x1] ss:$0 sm:$0xff] }
 0xcea   :  { %1031 = vrot.lane.b32.xlu1 %v1995_v39, %s1610_s28  ;;  %v1450_v39 = vld [vmem:[%s2176_s7 + $0x20] sm:$0xff] }
 0xceb   :  { %1093 = vmatpush.msrb.mxu3 %v1450_v39  ;;  %v1467_v39 = vld [vmem:[%s2182_s13 + $0x48] sm:$0xff] }
 0xd24   :  { %v892_v14 = vpop.xlane.xlu2 %891 }
 0xd2c   :  { %v896_v15 = vpop.permute.xlu2 %895 }
 0xd2d   :  { %916 = vmatpush.msra.mxu1 %v896_v15 }
 0xd2e   :  { %v826_v16 = vpop.xlane.xlu1 %825 }
 0xd2f   :  { %1555 = vrcp.f32 %v826_v16 }
 0xd30   :  { %1557 = vrcp.f32 %v892_v14 }
 0xd34   :  { %v966_v17 = vpop.permute.xlu2 %965 }
 0xd35   :  { %v1556_v18 = vpop.eup %1555  ;;  %986 = vmatpush.msrb.mxu2 %v966_v17 }
 0xd36   :  { %v828_v20 = vmul.f32 %v1556_v18, %v1550_v3  ;;  %v962_v21 = vpop.xlane.xlu0 %961  ;;  %v1558_v22 = vpop.eup %1557 }
 0xd37   :  { %1559 = vrcp.f32 %v962_v21  ;;  %v894_v25 = vmul.f32 %v1558_v22, %v1548_v61 }
 0xd38   :  { %1440 = vmatmul.msk.f32.vlgmr.msrb.gmra.mxu1 %vm256_vm8, %v828_v20 }
 0xd3d   :  { %v1560_v24 = vpop.eup %1559 }
 0xd3e   :  { %v964_v26 = vmul.f32 %v1560_v24, %v1552_v6 }
 0xd40   :  { %1443 = vmatmul.msk.f32.vlgmr.msra.gmra.mxu1 %vm256_vm8, %v894_v25  ;;  %1446 = vmatmul.msk.f32.vlgmr.msrb.gmra.mxu2 %vm256_vm8, %v964_v26 }
 0xd44   :  { %v1028_v27 = vpop.xlane.xlu1 %1027 }
 0xd45   :  { %1561 = vrcp.f32 %v1028_v27 }
 0xd4b   :  { %v1562_v28 = vpop.eup %1561 }
 0xd4c   :  { %v1030_v29 = vmul.f32 %v1562_v28, %v1554_v12 }
 0xd5c   :  { %v1032_v30 = vpop.permute.xlu1 %1031 }
 0xd5d   :  { %1052 = vmatpush.msrb.mxu1 %v1032_v30 }
 0xd5e   :  { %1449 = vmatmul.msk.f32.vlgmr.msrb.gmra.mxu1 %vm256_vm8, %v1030_v29 }
 0xdb5   :  { %v852_v31 = vpop.f32.mrf.mxu1 }
 0xdbd   :  { %v918_v36 = vpop.f32.mrf.mxu1 }
 0xdbe   :  { %922 = vrot.lane.b32.xlu2 %v918_v36, %s2212_s3  ;;  %v1470_v36 = vld [vmem:[%s2182_s13 + $0x60] sm:$0xff] }
 0xdc3   :  { %v988_v42 = vpop.f32.mrf.mxu2 }
 0xddb   :  { %v1054_v38 = vpop.f32.mrf.mxu1 }
 0xddc   :  { %1058 = vrot.lane.b32.xlu1 %v1054_v38, %s2212_s3  ;;  %v1468_v38 = vld [vmem:[%s2182_s13 + $0x50] sm:$0xff] }
 0xe18   :  { %v923_v40 = vpop.permute.xlu2 %922 }
 0xe19   :  { %v925_v41 = vsel %vm230_vm7, %v852_v31, %v923_v40  ;;  %v1473_v31 = vld [vmem:[%s2182_s13 + $0x78] sm:$0xff]  ;;  %v1466_v40 = vld [vmem:[%s2182_s13 + $0x40] sm:$0xff] }
 0xe1a   :  { %1455 = vmatmul.msk.f32.vlgmr.msrb.gmra.mxu3 %vm128_vm1, %v925_v41  ;;  %1246 = vmatpush.msrb.mxu0 %v1473_v31  ;;  %v1507_v41 = vld [vmem:[%s2181_s12 + $0x1] ss:$0 sm:$0xff]  ;;  %s1396_s12 = sshll.u32 %s1612_s24, 4  ;;  %s1397_s12 = int_to_ptr.vmem [resolvable:$true] %s1396_s12 }
 0xe1c   :  { %1247 = vmatpush.msrb.mxu0 %v1472_v33 }
 0xe1e   :  { %1248 = vmatpush.msrb.mxu0 %v1471_v35 }
 0xe20   :  { %1249 = vmatpush.msrb.mxu0 %v1470_v36 }
 0xe22   :  { %1250 = vmatpush.msrb.mxu0 %v1469_v37 }
 0xe24   :  { %1251 = vmatpush.msrb.mxu0 %v1468_v38 }
 0xe26   :  { %1252 = vmatpush.msrb.mxu0 %v1467_v39 }
 0xe28   :  { %1253 = vmatpush.msrb.mxu0 %v1466_v40 }
 0xe4e   :  { %v1059_v58 = vpop.permute.xlu1 %1058 }
 0xe4f   :  { %v1061_v43 = vsel %vm230_vm7, %v988_v42, %v1059_v58 }
 0xe50   :  { %1456 = vmatmul.msk.f32.gmra.mxu3 %vm128_vm1, %v1061_v43 }
 0xe9d   :  { %v1095_v45 = vpop.f32.mrf.mxu3 }
 0xe9e   :  { %v1096_v23 = vadd.f32 %v1504_v44, %v1095_v45 }
 0xea0   :  { %v1101_v46 = vadd.f32 %v1096_v23, %v1975_v19 }
 0xea2   :  { %v1107_v47 = vsel %vm128_vm1, %v1101_v46, 0.0 }
 0xea3   :  { %1108 = vadd.xlane.f32.xlu2 %v1107_v47 }
 0xed3   :  { %v1098_v48 = vpop.f32.mrf.mxu3 }
 0xed4   :  { %v1099_v49 = vadd.f32 %v1504_v44, %v1098_v48 }
 0xed6   :  { %v1102_v50 = vadd.f32 %v1099_v49, %v1980_v34  ;;  %v1462_v34 = vld [vmem:[%s2180_s11 + $0x38] sm:$0xff] }
 0xed7   :  { %1189 = vmatpush.msra.mxu2 %v1462_v34  ;;  %v1508_v34 = vld [vmem:[%s2183_s14 + $0x1] ss:$0 sm:$0xff]  ;;  %s1398_s14 = sshll.u32 %s2190_s21, 4  ;;  %s1399_s14 = int_to_ptr.hbm [resolvable:$true] %s1398_s14 }
 0xed8   :  { %v1110_v51 = vsel %vm128_vm1, %v1102_v50, 0.0 }
 0xed9   :  { %1111 = vadd.xlane.f32.xlu1 %v1110_v51  ;;  %1190 = vmatpush.msra.mxu2 %v1461_v62 }
 0xedb   :  { %1191 = vmatpush.msra.mxu2 %v1460_v63 }
 0xedd   :  { %1192 = vmatpush.msra.mxu2 %v1459_v0 }
 0xf16   :  { %v1109_v52 = vpop.xlane.xlu2 %1108 }
 0xf17   :  { %v1113_v53 = vmul.f32 %v1109_v52, %v1778_v32 }
 0xf19   :  { %v1115_v54 = vsub.f32 %v1101_v46, %v1113_v53 }
 0xf1b   :  { %v1117_v55 = vmul.f32 %v1115_v54, %v1115_v54 }
 0xf1d   :  { %v1119_v56 = vsel %vm128_vm1, %v1117_v55, 0.0 }
 0xf1e   :  { %1120 = vadd.xlane.f32.xlu0 %v1119_v56 }
 0xf4c   :  { %v1112_v57 = vpop.xlane.xlu1 %1111 }
 0xf4d   :  { %v1114_v19 = vmul.f32 %v1112_v57, %v1778_v32 }
 0xf4f   :  { %v1116_v59 = vsub.f32 %v1102_v50, %v1114_v19 }
 0xf51   :  { %v1118_v60 = vmul.f32 %v1116_v59, %v1116_v59 }
 0xf53   :  { %v1122_v61 = vsel %vm128_vm1, %v1118_v60, 0.0 }
 0xf54   :  { %1123 = vadd.xlane.f32.xlu0 %v1122_v61 }
 0xf91   :  { %v1121_v1 = vpop.xlane.xlu0 %1120 }
 0xf92   :  { %v1125_v2 = vmul.f32 %v1121_v1, %v1778_v32 }
 0xf94   :  { %v1127_v3 = vadd.f32 1e-12, %v1125_v2 }
 0xf96   :  { %1563 = vrsqrt.f32 %v1127_v3  ;;  %vm1135_vm8 = vweird.f32 %v1127_v3 }
 0xf9c   :  { %v1564_v4 = vpop.eup %1563 }
 0xf9d   :  { %v1130_v5 = vmul.f32 %v1564_v4, %v1127_v3  ;;  %vm1136_vm7 = vweird.f32 %v1564_v4 }
 0xf9e   :  { %vm1137_vm12 = vmor %vm1135_vm8, %vm1136_vm7 }
 0xf9f   :  { %v1131_v6 = vmul.f32 %v1564_v4, %v1130_v5 }
 0xfa1   :  { %v1132_v7 = vmul.f32 0.5, %v1131_v6 }
 0xfa3   :  { %v1133_v8 = vsub.f32 1.5, %v1132_v7 }
 0xfa5   :  { %v1134_v9 = vmul.f32 %v1564_v4, %v1133_v8 }
 0xfa7   :  { %v1138_v11 = vsel %vm1137_vm12, %v1564_v4, %v1134_v9 }
 0xfa8   :  { %v1149_v12 = vmul.f32 %v1138_v11, %v1115_v54 }
 0xfaa   :  { %v1154_v14 = vmul.f32 %v1505_v10, %v1149_v12 }
 0xfac   :  { %v2081_v15 = vadd.f32 %v1506_v13, %v1154_v14 }
 0xfae   :  { %1464 = vmatmul.msk.f32.vlgmr.msra.gmra.mxu2 %vm128_vm1, %v2081_v15 }
 0xfc7   :  { %v1124_v16 = vpop.xlane.xlu0 %1123 }
 0xfc8   :  { %v1126_v17 = vmul.f32 %v1124_v16, %v1778_v32 }
 0xfca   :  { %v1128_v18 = vadd.f32 1e-12, %v1126_v17 }
 0xfcc   :  { %1565 = vrsqrt.f32 %v1128_v18  ;;  %vm1145_vm14 = vweird.f32 %v1128_v18 }
 0xfd2   :  { %v1566_v20 = vpop.eup %1565 }
 0xfd3   :  { %v1140_v21 = vmul.f32 %v1566_v20, %v1128_v18  ;;  %vm1146_vm13 = vweird.f32 %v1566_v20 }
 0xfd4   :  { %vm1147_vm15 = vmor %vm1145_vm14, %vm1146_vm13 }
 0xfd5   :  { %v1141_v22 = vmul.f32 %v1566_v20, %v1140_v21  ;;  %v1328_v21 = vld [vmem:[%s2186_s17 + $0x10] sm:$0xff] }
 0xfd7   :  { %v1142_v24 = vmul.f32 0.5, %v1141_v22 }
 0xfd9   :  { %v1143_v25 = vsub.f32 1.5, %v1142_v24  ;;  %v1327_v24 = vld [vmem:[%s2186_s17 + $0x8] sm:$0xff] }
 0xfdb   :  { %v1144_v26 = vmul.f32 %v1566_v20, %v1143_v25  ;;  %v1326_v25 = vld [vmem:[%s2186_s17] sm:$0xff] }
 0xfdd   :  { %v1148_v27 = vsel %vm1147_vm15, %v1566_v20, %v1144_v26  ;;  %v1329_v20 = vld [vmem:[%s2186_s17 + $0x18] sm:$0xff] }
 0xfde   :  { %v1150_v28 = vmul.f32 %v1148_v27, %v1116_v59  ;;  %1349 = vmatpush.msra.mxu1 %v1329_v20 }
 0xfe0   :  { %v1155_v29 = vmul.f32 %v1505_v10, %v1150_v28  ;;  %1350 = vmatpush.msra.mxu1 %v1328_v21 }
 0xfe2   :  { %v1160_v30 = vadd.f32 %v1506_v13, %v1155_v29  ;;  %1351 = vmatpush.msra.mxu1 %v1327_v24 }
 0xfe4   :  { %1465 = vmatmul.msk.f32.gmra.mxu2 %vm128_vm1, %v1160_v30  ;;  %1352 = vmatpush.msra.mxu1 %v1326_v25 }
0x1031   :  { %v1194_v42 = vpop.f32.mrf.mxu2 }
0x1032   :  { %v1195_v58 = vadd.f32 %v1507_v41, %v1194_v42 }
0x1034   :  { %v1202_v43 = vmul.f32 0.044715, %v1195_v58  ;;  %v1200_v48 = vmul.f32 0.5, %v1195_v58 }
0x1036   :  { %v1204_v44 = vmul.f32 %v1202_v43, %v1195_v58 }
0x1038   :  { %v1206_v45 = vmul.f32 %v1204_v44, %v1195_v58 }
0x103a   :  { %v1208_v23 = vadd.f32 %v1206_v45, %v1195_v58 }
0x103c   :  { %v1210_v46 = vmul.f32 0.7978846, %v1208_v23 }
0x103e   :  { %1567 = vtanh.f32 %v1210_v46  ;;  %v1510_v46 = vld [vmem:[%s2211_s22 + $0x1] ss:$0 sm:$0xff] }
0x1044   :  { %v1568_v47 = vpop.eup %1567 }
0x1045   :  { %v1214_v49 = vadd.f32 1.0, %v1568_v47 }
0x1047   :  { %v1216_v50 = vmul.f32 %v1214_v49, %v1200_v48 }
0x1049   :  { %1475 = vmatmul.msk.f32.vlgmr.msrb.gmra.mxu0 %vm663_vm3, %v1216_v50 }
0x1067   :  { %v1197_v51 = vpop.f32.mrf.mxu2 }
0x1068   :  { %v1198_v52 = vadd.f32 %v1507_v41, %v1197_v51  ;;  %v1361_v51 = vld [vmem:[%s2188_s19 + $0x18] sm:$0xff] }
0x1069   :  { %1381 = vmatpush.msrb.mxu1 %v1361_v51 }
0x106a   :  { %v1203_v53 = vmul.f32 0.044715, %v1198_v52  ;;  %v1201_v59 = vmul.f32 0.5, %v1198_v52 }
0x106c   :  { %v1205_v54 = vmul.f32 %v1203_v53, %v1198_v52  ;;  %v1359_v53 = vld [vmem:[%s2188_s19 + $0x8] sm:$0xff] }
0x106e   :  { %v1207_v55 = vmul.f32 %v1205_v54, %v1198_v52  ;;  %v1358_v54 = vld [vmem:[%s2188_s19] sm:$0xff] }
0x1070   :  { %v1209_v56 = vadd.f32 %v1207_v55, %v1198_v52  ;;  %v1360_v52 = vld [vmem:[%s2188_s19 + $0x10] sm:$0xff]  ;;  %v1511_v55 = vld [vmem:[%s2187_s18] ss:$0 sm:$0xff] }
0x1071   :  { %1382 = vmatpush.msrb.mxu1 %v1360_v52 }
0x1072   :  { %v1211_v57 = vmul.f32 0.7978846, %v1209_v56 }
0x1073   :  { %1383 = vmatpush.msrb.mxu1 %v1359_v53 }
0x1074   :  { %1569 = vtanh.f32 %v1211_v57 }
0x1075   :  { %1384 = vmatpush.msrb.mxu1 %v1358_v54 }
0x107a   :  { %v1570_v19 = vpop.eup %1569 }
0x107b   :  { %v1215_v60 = vadd.f32 1.0, %v1570_v19 }
0x107d   :  { %v1217_v61 = vmul.f32 %v1215_v60, %v1201_v59  ;;  %v1512_v59 = vld [vmem:[%s2189_s20] ss:$0 sm:$0xff] }
0x107f   :  { %1476 = vmatmul.msk.f32.gmra.mxu0 %vm663_vm3, %v1217_v61 }
0x10c6   :  { %v1255_v62 = vpop.f32.mrf.mxu0 }
0x10c7   :  { %v1256_v63 = vadd.f32 %v1508_v34, %v1255_v62 }
0x10c9   :  { %v1261_v0 = vadd.f32 %v1256_v63, %v2081_v15 }
0x10cb   :  { %v1267_v1 = vsel %vm128_vm1, %v1261_v0, 0.0 }
0x10cc   :  { %1268 = vadd.xlane.f32.xlu2 %v1267_v1 }
0x10fc   :  { %v1258_v2 = vpop.f32.mrf.mxu0 }
0x10fd   :  { %v1259_v3 = vadd.f32 %v1508_v34, %v1258_v2 }
0x10ff   :  { %v1262_v4 = vadd.f32 %v1259_v3, %v1160_v30 }
0x1101   :  { %v1270_v5 = vsel %vm128_vm1, %v1262_v4, 0.0 }
0x1102   :  { %1271 = vadd.xlane.f32.xlu0 %v1270_v5 }
0x113f   :  { %v1269_v6 = vpop.xlane.xlu2 %1268 }
0x1140   :  { %v1273_v7 = vmul.f32 %v1269_v6, %v1778_v32 }
0x1142   :  { %v1275_v8 = vsub.f32 %v1261_v0, %v1273_v7 }
0x1144   :  { %v1277_v9 = vmul.f32 %v1275_v8, %v1275_v8 }
0x1146   :  { %v1279_v10 = vsel %vm128_vm1, %v1277_v9, 0.0 }
0x1147   :  { %1280 = vadd.xlane.f32.xlu0 %v1279_v10 }
0x1175   :  { %v1272_v11 = vpop.xlane.xlu0 %1271 }
0x1176   :  { %v1274_v12 = vmul.f32 %v1272_v11, %v1778_v32 }
0x1178   :  { %v1276_v13 = vsub.f32 %v1262_v4, %v1274_v12 }
0x117a   :  { %v1278_v14 = vmul.f32 %v1276_v13, %v1276_v13 }
0x117c   :  { %v1282_v15 = vsel %vm128_vm1, %v1278_v14, 0.0 }
0x117d   :  { %1283 = vadd.xlane.f32.xlu1 %v1282_v15 }
0x11ba   :  { %v1281_v16 = vpop.xlane.xlu0 %1280 }
0x11bb   :  { %v1285_v17 = vmul.f32 %v1281_v16, %v1778_v32 }
0x11bd   :  { %v1287_v18 = vadd.f32 1e-12, %v1285_v17 }
0x11bf   :  { %1571 = vrsqrt.f32 %v1287_v18  ;;  %vm1295_vm2 = vweird.f32 %v1287_v18 }
0x11c5   :  { %v1572_v22 = vpop.eup %1571 }
0x11c6   :  { %v1290_v26 = vmul.f32 %v1572_v22, %v1287_v18  ;;  %vm1296_vm0 = vweird.f32 %v1572_v22 }
0x11c7   :  { %vm1297_vm3 = vmor %vm1295_vm2, %vm1296_vm0 }
0x11c8   :  { %v1291_v29 = vmul.f32 %v1572_v22, %v1290_v26 }
0x11ca   :  { %v1292_v31 = vmul.f32 0.5, %v1291_v29 }
0x11cc   :  { %v1293_v33 = vsub.f32 1.5, %v1292_v31 }
0x11ce   :  { %v1294_v37 = vmul.f32 %v1572_v22, %v1293_v33 }
0x11d0   :  { %v1298_v40 = vsel %vm1297_vm3, %v1572_v22, %v1294_v37 }
0x11d1   :  { %v1309_v58 = vmul.f32 %v1298_v40, %v1275_v8 }
0x11f0   :  { %v1284_v27 = vpop.xlane.xlu1 %1283 }
0x11f1   :  { %v1286_v28 = vmul.f32 %v1284_v27, %v1778_v32  ;;  %v1509_v32 = vld [vmem:[%s2184_s15 + $0x1] ss:$0 sm:$0xff] }
0x11f2   :  { %v1314_v45 = vmul.f32 %v1509_v32, %v1309_v58 }
0x11f3   :  { %v1288_v30 = vadd.f32 1e-12, %v1286_v28 }
0x11f4   :  { %v1319_v48 = vadd.f32 %v1510_v46, %v1314_v45 }
0x11f5   :  { %1573 = vrsqrt.f32 %v1288_v30  ;;  %vm1305_vm5 = vweird.f32 %v1288_v30 }
0x11fb   :  { %v1574_v35 = vpop.eup %1573 }
0x11fc   :  { %v1300_v36 = vmul.f32 %v1574_v35, %v1288_v30  ;;  %vm1306_vm4 = vweird.f32 %v1574_v35 }
0x11fd   :  { %vm1307_vm6 = vmor %vm1305_vm5, %vm1306_vm4 }
0x11fe   :  { %v1301_v38 = vmul.f32 %v1574_v35, %v1300_v36 }
0x1200   :  { %v1302_v39 = vmul.f32 0.5, %v1301_v38 }
0x1202   :  { %v1303_v41 = vsub.f32 1.5, %v1302_v39 }
0x1204   :  { %v1304_v42 = vmul.f32 %v1574_v35, %v1303_v41 }
0x1206   :  { %v1308_v43 = vsel %vm1307_vm6, %v1574_v35, %v1304_v42 }
0x1207   :  { %v1310_v44 = vmul.f32 %v1308_v43, %v1276_v13 }
0x1209   :  { %v1315_v23 = vmul.f32 %v1509_v32, %v1310_v44 }
0x120b   :  { %v1320_v47 = vadd.f32 %v1510_v46, %v1315_v23 }
0x120d   :  { %v1322_v49 = vrot.slane %v1320_v47, 7 }
0x120f   :  { %v1325_v50 = vsel %vm1324_vm9, %v1319_v48, %v1322_v49 }
0x1210   :  { %1479 = vmatmul.msk.f32.vlgmr.msra.gmra.mxu1 %vm128_vm1, %v1325_v50 }
0x128d   :  { %v1354_v56 = vpop.f32.mrf.mxu1 }
0x128e   :  { %v1355_v57 = vadd.f32 %v1511_v55, %v1354_v56 }
0x1290   :  { %1575 = vtanh.f32 %v1355_v57 }
0x1296   :  { %v1576_v19 = vpop.eup %1575 }
0x1297   :  { %1480 = vmatmul.msk.f32.vlgmr.msrb.gmra.mxu1 %vm128_vm1, %v1576_v19 }
0x1314   :  { %v1386_v60 = vpop.f32.mrf.mxu1 }
0x1315   :  { %v1387_v61 = vadd.f32 %v1512_v59, %v1386_v60 }
0x1317   :  { %1390 = vst.msk [vmem:[#allocation2] sm:$0x3] %vm1389_vm10, %v1387_v61 }
0x1318   :  { %1401 = dma.vmem_to_hbm [thread:$0]  %s1397_s12, 32, %s1399_s14, [#allocation3]  }
0x1319   :  { %1601 = dma.done.wait [#allocation3], 32  }
0x131a   :  { %1602 = vsyncadd [#allocation3], 4294967264 }
0x131b   :  { %1406 = vsyncpa [#allocation3], 1 }

</bundles_post_ra>
